<compile_context>
chip_gen: v7x
topology: tpu7x:2x2x1
jax: 0.10.0
libtpu: 0.0.40
codegen_flags: <defaults>
</compile_context>

<pallas_src>
import jax
import jax.numpy as jnp
from jax.experimental import pallas as pl
from jax.experimental.pallas import tpu as pltpu

EPS = 1e-5
LANE = 128


def _vmem_limit_bytes():
    cap = 128 * 1024 * 1024
    try:
        info = pltpu.get_tpu_info()
        cap = int(getattr(info, "vmem_capacity_bytes", cap) or cap)
    except Exception:
        pass
    # Leave ~25% headroom for double-buffers / compiler-internal scratch.
    return max(32 * 1024 * 1024, (cap * 3) // 4)


# -------------------------- in-kernel helpers --------------------------------

def _channel_stats(z):
    """Per-channel [sum; sum_of_squares] of a (rows, C) f32 block -> (2, C)."""
    return jnp.concatenate([jnp.sum(z, axis=0, keepdims=True),
                            jnp.sum(z * z, axis=0, keepdims=True)], axis=0)


def _conv_matmul(taps, w_ref, cin, accumulate):
    """3x3 conv as matmul.  taps: 9 (Ho, Wo, cin) slabs already in MXU dtype.

    accumulate=False: fold the 9 taps into the contraction dim (one matmul);
    accumulate=True : 9 accumulating matmuls against row-slices of w_ref
                      (no full-tile concat copy; used when cin >= 128).
    """
    Ho, Wo, _ = taps[0].shape
    rows = Ho * Wo
    if not accumulate:
        patch = jnp.concatenate(taps, axis=-1).reshape(rows, len(taps) * cin)
        return jnp.dot(patch, w_ref[...], preferred_element_type=jnp.float32)
    acc = jnp.dot(taps[0].reshape(rows, cin), w_ref[0:cin, :],
                  preferred_element_type=jnp.float32)
    for t in range(1, len(taps)):
        acc = acc + jnp.dot(taps[t].reshape(rows, cin),
                            w_ref[t * cin:(t + 1) * cin, :],
                            preferred_element_type=jnp.float32)
    return acc


# ------------------------------- kernels --------------------------------------

def _make_conv1_kernel(stride, Ho, Wo, Cp, n_phases, use_shortcut, accumulate, cin):
    """conv1 (+ folded 1x1 shortcut conv) as one matmul + per-step BN partials."""
    def kernel(*refs):
        phase_refs = refs[:n_phases]
        w_ref = refs[n_phases]
        if use_shortcut:
            z1_ref, zs_ref, st1_ref, sts_ref = refs[n_phases + 1:]
        else:
            z1_ref, st1_ref = refs[n_phases + 1:]
        taps = []
        for kh in range(3):
            for kw in range(3):
                ph = phase_refs[(kh % stride) * stride + (kw % stride)]
                r0, c0 = kh // stride, kw // stride
                taps.append(ph[r0:r0 + Ho, c0:c0 + Wo, :])
        z = _conv_matmul(taps, w_ref, cin, accumulate)   # (HoWo, Cp|2Cp) f32
        z1 = z[:, :Cp] if use_shortcut else z
        z1_ref[...] = z1.astype(z1_ref.dtype)
        st1_ref[...] = _channel_stats(z1)
        if use_shortcut:
            zs = z[:, Cp:]
            zs_ref[...] = zs.astype(zs_ref.dtype)
            sts_ref[...] = _channel_stats(zs)
    return kernel


def _make_conv2_kernel(Ho, Wo, Cp, accumulate):
    """bn1-apply + relu (VMEM only) -> conv2 + per-step BN stats partials."""
    def kernel(z1_ref, sc1_ref, sh1_ref, w2_ref, z2_ref, st2_ref, pad_ref):
        mm = pad_ref.dtype
        y1 = jnp.maximum(
            z1_ref[...].astype(jnp.float32) * sc1_ref[...] + sh1_ref[...], 0.0)
        # Zero only the 1-pixel border; the interior is fully overwritten below.
        zrow = jnp.zeros((1, Wo + 2, Cp), mm)
        zcol = jnp.zeros((Ho + 2, 1, Cp), mm)
        pad_ref[0:1, :, :] = zrow
        pad_ref[Ho + 1:Ho + 2, :, :] = zrow
        pad_ref[:, 0:1, :] = zcol
        pad_ref[:, Wo + 1:Wo + 2, :] = zcol
        pad_ref[1:Ho + 1, 1:Wo + 1, :] = y1.reshape(Ho, Wo, Cp).astype(mm)
        taps = [pad_ref[kh:kh + Ho, kw:kw + Wo, :]
                for kh in range(3) for kw in range(3)]
        z2 = _conv_matmul(taps, w2_ref, Cp, accumulate)
        z2_ref[...] = z2.astype(z2_ref.dtype)
        st2_ref[...] = _channel_stats(z2)
    return kernel


def _make_bn_add_relu_kernel(use_shortcut, emit_add, Cout, Cp):
    """Apply bn2 (+ bn_shortcut), residual add, relu.  Pure elementwise."""
    def kernel(*refs):
        if use_shortcut:
            z2_ref, zs_ref, sc2_ref, sh2_ref, scs_ref, shs_ref = refs[:6]
            out_refs = refs[6:]
            shortcut = zs_ref[...].astype(jnp.float32) * scs_ref[...] + shs_ref[...]
        else:
            z2_ref, x_ref, sc2_ref, sh2_ref = refs[:4]
            out_refs = refs[4:]
            shortcut = x_ref[...].astype(jnp.float32)
            if Cp > Cout:
                shortcut = jnp.concatenate(
                    [shortcut,
                     jnp.zeros((shortcut.shape[0], Cp - Cout), jnp.float32)],
                    axis=-1)
        pre = z2_ref[...].astype(jnp.float32) * sc2_ref[...] + sh2_ref[...] + shortcut
        if emit_add:
            out_refs[0][...] = pre
            out_refs[1][...] = jnp.maximum(pre, 0.0)
        else:
            out_refs[0][...] = jnp.maximum(pre, 0.0)
    return kernel


# ------------------------------- JAX glue --------------------------------------

def _fold_w3x3(w, cin_pad, cout_pad):
    """(Cout, Cin, 3, 3) -> (9*cin_pad, cout_pad); tap-major, channel-minor rows."""
    Cout, Cin = w.shape[0], w.shape[1]
    w = jnp.pad(w, ((0, cout_pad - Cout), (0, cin_pad - Cin), (0, 0), (0, 0)))
    return jnp.transpose(w, (2, 3, 1, 0)).reshape(9 * cin_pad, cout_pad)


def _bn_affine(stats, gamma, beta, count):
    """Per-channel scale/shift from summed [sum; sumsq] (training-mode BN)."""
    C = stats.shape[-1]
    gamma = jnp.pad(gamma.astype(jnp.float32), (0, C - gamma.shape[0]))
    beta = jnp.pad(beta.astype(jnp.float32), (0, C - beta.shape[0]))
    mean = stats[0] / count
    var = jnp.maximum(stats[1] / count - mean * mean, 0.0)   # biased variance
    scale = gamma * jax.lax.rsqrt(var + EPS)
    shift = beta - mean * scale
    return scale.reshape(1, C), shift.reshape(1, C)


class ResidualBlockPallas:
    """Pallas port of the PyTorch ResidualBlock (forward, training-mode BN)."""

    def __init__(self, in_channels, out_channels, stride=1, key=None,
                 matmul_dtype=jnp.bfloat16):
        if key is None:
            key = jax.random.PRNGKey(0)
        k1, k2, k3, k4, k5, k6, k7, k8, k9 = jax.random.split(key, 9)
        self.in_channels, self.out_channels, self.stride = in_channels, out_channels, stride
        self.use_shortcut = stride != 1 or in_channels != out_channels
        self.matmul_dtype = matmul_dtype

        self.w1 = jax.random.normal(k1, (out_channels, in_channels, 3, 3), jnp.float32) \
            / jnp.sqrt(9.0 * in_channels)
        self.g1 = 1.0 + 0.1 * jax.random.normal(k2, (out_channels,), jnp.float32)
        self.b1 = 0.1 * jax.random.normal(k3, (out_channels,), jnp.float32)

        self.w2 = jax.random.normal(k4, (out_channels, out_channels, 3, 3), jnp.float32) \
            / jnp.sqrt(9.0 * out_channels)
        self.g2 = 1.0 + 0.1 * jax.random.normal(k5, (out_channels,), jnp.float32)
        self.b2 = 0.1 * jax.random.normal(k6, (out_channels,), jnp.float32)

        if self.use_shortcut:
            self.ws = jax.random.normal(k7, (out_channels, in_channels, 1, 1), jnp.float32) \
                / jnp.sqrt(1.0 * in_channels)
            self.gs = 1.0 + 0.1 * jax.random.normal(k8, (out_channels,), jnp.float32)
            self.bs = 0.1 * jax.random.normal(k9, (out_channels,), jnp.float32)

    def __call__(self, x_nchw, fmap_dict=None, prefix=''):
        Cin, Cout, s = self.in_channels, self.out_channels, self.stride
        mm = self.matmul_dtype
        Cp = ((Cout + LANE - 1) // LANE) * LANE
        x_nhwc = jnp.transpose(x_nchw, (0, 2, 3, 1)).astype(jnp.float32)
        N, H, W, _ = x_nhwc.shape
        Ho = (H - 1) // s + 1
        Wo = (W - 1) // s + 1
        HoWo = Ho * Wo
        count = float(N * HoWo)

        cparams = pltpu.CompilerParams(
            dimension_semantics=("parallel",),
            vmem_limit_bytes=_vmem_limit_bytes())

        # --- bf16 pad + stride-phase decomposition (one copy of the input) ----
        xp = jnp.pad(x_nhwc.astype(mm), ((0, 0), (1, 1), (1, 1), (0, 0)))
        phases = [xp[:, ph::s, pw::s, :] for ph in range(s) for pw in range(s)]

        # --- folded weights (output channels padded to Cp; shortcut folded) ---
        w1f = _fold_w3x3(self.w1, Cin, Cp)
        if self.use_shortcut:
            ws2d = jnp.pad(self.ws.reshape(Cout, Cin).T, ((0, 0), (0, Cp - Cout)))
            wsf = jnp.zeros((9 * Cin, Cp), jnp.float32)
            wsf = wsf.at[4 * Cin:5 * Cin, :].set(ws2d)      # centre tap only
            wA = jnp.concatenate([w1f, wsf], axis=1).astype(mm)   # (9*Cin, 2*Cp)
        else:
            wA = w1f.astype(mm)

        z_spec = pl.BlockSpec((None, HoWo, Cp), lambda n: (n, 0, 0))
        st_spec = pl.BlockSpec((None, 2, Cp), lambda n: (n, 0, 0))
        par_spec = pl.BlockSpec((1, Cp), lambda n: (0, 0))
        z_sds = jax.ShapeDtypeStruct((N, HoWo, Cp), mm)
        st_sds = jax.ShapeDtypeStruct((N, 2, Cp), jnp.float32)

        # ----------- kernel A: conv1 (+ folded 1x1 shortcut) + stats ----------
        in_specs_a = [pl.BlockSpec((None,) + tuple(p.shape[1:]),
                                   lambda n: (n, 0, 0, 0)) for p in phases]
        in_specs_a.append(pl.BlockSpec(wA.shape, lambda n: (0, 0)))
        if self.use_shortcut:
            out_specs_a = (z_spec, z_spec, st_spec, st_spec)
            out_shape_a = (z_sds, z_sds, st_sds, st_sds)
        else:
            out_specs_a = (z_spec, st_spec)
            out_shape_a = (z_sds, st_sds)
        res_a = pl.pallas_call(
            _make_conv1_kernel(s, Ho, Wo, Cp, len(phases), self.use_shortcut,
                               Cin >= LANE, Cin),
            grid=(N,), in_specs=in_specs_a, out_specs=out_specs_a,
            out_shape=out_shape_a, compiler_params=cparams,
        )(*phases, wA)
        if self.use_shortcut:
            z1, zs, st1p, stsp = res_a
        else:
            z1, st1p = res_a
            zs, stsp = None, None

        sc1, sh1 = _bn_affine(jnp.sum(st1p, axis=0), self.g1, self.b1, count)

        # --------- kernel B: bn1+relu (VMEM only) -> conv2 + stats ------------
        w2f = _fold_w3x3(self.w2, Cp, Cp).astype(mm)
        z2, st2p = pl.pallas_call(
            _make_conv2_kernel(Ho, Wo, Cp, True),
            grid=(N,),
            in_specs=[z_spec, par_spec, par_spec,
                      pl.BlockSpec(w2f.shape, lambda n: (0, 0))],
            out_specs=(z_spec, st_spec),
            out_shape=(z_sds, st_sds),
            scratch_shapes=[pltpu.VMEM((Ho + 2, Wo + 2, Cp), mm)],
            compiler_params=cparams,
        )(z1, sc1, sh1, w2f)

        sc2, sh2 = _bn_affine(jnp.sum(st2p, axis=0), self.g2, self.b2, count)

        # ------------- kernel C: bn2 (+ bn_shortcut) + add + relu --------------
        emit_add = fmap_dict is not None
        if self.use_shortcut:
            scs, shs = _bn_affine(jnp.sum(stsp, axis=0), self.gs, self.bs, count)
            c_inputs = (z2, zs, sc2, sh2, scs, shs)
            c_in_specs = [z_spec, z_spec, par_spec, par_spec, par_spec, par_spec]
        else:
            x_flat = x_nhwc.reshape(N, HoWo, Cout)   # stride == 1, Cin == Cout
            c_inputs = (z2, x_flat, sc2, sh2)
            c_in_specs = [z_spec,
                          pl.BlockSpec((None, HoWo, Cout), lambda n: (n, 0, 0)),
                          par_spec, par_spec]

        out_spec = pl.BlockSpec((None, HoWo, Cp), lambda n: (n, 0, 0))
        out_sds = jax.ShapeDtypeStruct((N, HoWo, Cp), jnp.float32)
        kernel_c = _make_bn_add_relu_kernel(self.use_shortcut, emit_add, Cout, Cp)
        if emit_add:
            out_add, out = pl.pallas_call(
                kernel_c, grid=(N,), in_specs=c_in_specs,
                out_specs=(out_spec, out_spec), out_shape=(out_sds, out_sds),
                compiler_params=cparams)(*c_inputs)
        else:
            out_add = None
            out = pl.pallas_call(
                kernel_c, grid=(N,), in_specs=c_in_specs,
                out_specs=out_spec, out_shape=out_sds,
                compiler_params=cparams)(*c_inputs)

        def to_nchw(a):
            return jnp.transpose(a[:, :, :Cout].reshape(N, Ho, Wo, Cout), (0, 3, 1, 2))

        out_nchw = to_nchw(out)
        if fmap_dict is not None:
            fmap_dict[f'{prefix}.conv'] = to_nchw(out_add)
            fmap_dict[f'{prefix}.relu'] = out_nchw
        return out_nchw


# --------------------------- pure-JAX reference --------------------------------

def residual_block_ref(block, x_nchw):
    """Reference at matched precision: bf16 conv inputs, f32 accumulation,
    bf16 inter-stage activation storage (mirrors the Pallas data path)."""
    mm = block.matmul_dtype

    def conv(x, w, stride, padding):
        out = jax.lax.conv_general_dilated(
            x.astype(mm), w.astype(mm),
            window_strides=(stride, stride), padding=padding,
            dimension_numbers=('NCHW', 'OIHW', 'NCHW'),
            preferred_element_type=jnp.float32)
        return out.astype(mm).astype(jnp.float32)   # model bf16 intermediate storage

    def bn(z, gamma, beta):
        mean = jnp.mean(z, axis=(0, 2, 3), keepdims=True)
        var = jnp.mean(z * z, axis=(0, 2, 3), keepdims=True) - mean * mean
        return (z - mean) * jax.lax.rsqrt(jnp.maximum(var, 0.0) + EPS) \
            * gamma.reshape(1, -1, 1, 1) + beta.reshape(1, -1, 1, 1)

    x32 = x_nchw.astype(jnp.float32)
    out = conv(x32, block.w1, block.stride, [(1, 1), (1, 1)])
    out = jnp.maximum(bn(out, block.g1, block.b1), 0.0)
    out = conv(out, block.w2, 1, [(1, 1), (1, 1)])
    out = bn(out, block.g2, block.b2)
    if block.use_shortcut:
        sc = conv(x32, block.ws, block.stride, [(0, 0), (0, 0)])
        sc = bn(sc, block.gs, block.bs)
    else:
        sc = x32
    return jnp.maximum(out + sc, 0.0)


if __name__ == "__main__":
    key = jax.random.PRNGKey(0)
    kx, kp, kx2, kp2 = jax.random.split(key, 4)

    # Case 1: channel change + stride 2 -> exercises the folded 1x1 shortcut.
    N, Cin, H, W = 2, 4, 16, 16
    Cout, stride = 8, 2
    x = jax.random.normal(kx, (N, Cin, H, W), jnp.float32)
    block = ResidualBlockPallas(Cin, Cout, stride=stride, key=kp)
    fmaps = {}
    out = jax.block_until_ready(block(x, fmap_dict=fmaps, prefix='blk0'))
    assert out.shape == (N, Cout, H // stride, W // stride), out.shape
    assert 'blk0.conv' in fmaps and 'blk0.relu' in fmaps
    ref = residual_block_ref(block, x)
    err = float(jnp.max(jnp.abs(out - ref)))
    assert jnp.allclose(out, ref, atol=2e-2, rtol=2e-2), f"case1 max abs err = {err}"

    # Case 2: identity shortcut (stride 1, same channels), no fmap outputs.
    x2 = jax.random.normal(kx2, (2, 8, 16, 16), jnp.float32)
    block2 = ResidualBlockPallas(8, 8, stride=1, key=kp2)
    out2 = jax.block_until_ready(block2(x2))
    assert out2.shape == (2, 8, 16, 16), out2.shape
    ref2 = residual_block_ref(block2, x2)
    err2 = float(jnp.max(jnp.abs(out2 - ref2)))
    assert jnp.allclose(out2, ref2, atol=2e-2, rtol=2e-2), f"case2 max abs err = {err2}"

    print("KERNEL_OK")
</pallas_src>

<mosaic_0001>
module attributes {stable_mosaic.version = 11 : i64} {
  func.func @kernel(%arg0: i32, %arg1: memref<1x9x9x4xbf16, #tpu.memory_space<vmem>>, %arg2: memref<1x9x9x4xbf16, #tpu.memory_space<vmem>>, %arg3: memref<1x9x9x4xbf16, #tpu.memory_space<vmem>>, %arg4: memref<1x9x9x4xbf16, #tpu.memory_space<vmem>>, %arg5: memref<36x256xbf16, #tpu.memory_space<vmem>>, %arg6: memref<1x64x128xbf16, #tpu.memory_space<vmem>>, %arg7: memref<1x64x128xbf16, #tpu.memory_space<vmem>>, %arg8: memref<1x2x128xf32, #tpu.memory_space<vmem>>, %arg9: memref<1x2x128xf32, #tpu.memory_space<vmem>>) attributes {dimension_semantics = [#tpu.dimension_semantics<parallel>], iteration_bounds = array<i64: 2>, scalar_prefetch = 0 : i64, scratch_operands = 0 : i64, tpu.core_type = #tpu.core_type<tc>, window_params = [{transform_indices = @transform_0, window_bounds = array<i64: 1, 9, 9, 4>}, {transform_indices = @transform_1, window_bounds = array<i64: 1, 9, 9, 4>}, {transform_indices = @transform_2, window_bounds = array<i64: 1, 9, 9, 4>}, {transform_indices = @transform_3, window_bounds = array<i64: 1, 9, 9, 4>}, {pipeline_mode = #tpu.pipeline_mode<synchronous>, transform_indices = @transform_4, window_bounds = array<i64: 36, 256>}, {transform_indices = @transform_5, window_bounds = array<i64: 1, 64, 128>}, {transform_indices = @transform_6, window_bounds = array<i64: 1, 64, 128>}, {transform_indices = @transform_7, window_bounds = array<i64: 1, 2, 128>}, {transform_indices = @transform_8, window_bounds = array<i64: 1, 2, 128>}]} {
    %c0 = arith.constant 0 : index
    %c0_0 = arith.constant 0 : index
    %c0_1 = arith.constant 0 : index
    %c0_2 = arith.constant 0 : index
    %0 = vector.load %arg1[%c0, %c0_0, %c0_1, %c0_2] : memref<1x9x9x4xbf16, #tpu.memory_space<vmem>>, vector<1x8x8x4xbf16>
    %1 = vector.shape_cast %0 : vector<1x8x8x4xbf16> to vector<8x8x4xbf16>
    %c0_3 = arith.constant 0 : index
    %c0_4 = arith.constant 0 : index
    %c0_5 = arith.constant 0 : index
    %c0_6 = arith.constant 0 : index
    %2 = vector.load %arg2[%c0_3, %c0_4, %c0_5, %c0_6] : memref<1x9x9x4xbf16, #tpu.memory_space<vmem>>, vector<1x8x8x4xbf16>
    %3 = vector.shape_cast %2 : vector<1x8x8x4xbf16> to vector<8x8x4xbf16>
    %c0_7 = arith.constant 0 : index
    %c0_8 = arith.constant 0 : index
    %c1 = arith.constant 1 : index
    %c0_9 = arith.constant 0 : index
    %4 = vector.load %arg1[%c0_7, %c0_8, %c1, %c0_9] : memref<1x9x9x4xbf16, #tpu.memory_space<vmem>>, vector<1x8x8x4xbf16>
    %5 = vector.shape_cast %4 : vector<1x8x8x4xbf16> to vector<8x8x4xbf16>
    %c0_10 = arith.constant 0 : index
    %c0_11 = arith.constant 0 : index
    %c0_12 = arith.constant 0 : index
    %c0_13 = arith.constant 0 : index
    %6 = vector.load %arg3[%c0_10, %c0_11, %c0_12, %c0_13] : memref<1x9x9x4xbf16, #tpu.memory_space<vmem>>, vector<1x8x8x4xbf16>
    %7 = vector.shape_cast %6 : vector<1x8x8x4xbf16> to vector<8x8x4xbf16>
    %c0_14 = arith.constant 0 : index
    %c0_15 = arith.constant 0 : index
    %c0_16 = arith.constant 0 : index
    %c0_17 = arith.constant 0 : index
    %8 = vector.load %arg4[%c0_14, %c0_15, %c0_16, %c0_17] : memref<1x9x9x4xbf16, #tpu.memory_space<vmem>>, vector<1x8x8x4xbf16>
    %9 = vector.shape_cast %8 : vector<1x8x8x4xbf16> to vector<8x8x4xbf16>
    %c0_18 = arith.constant 0 : index
    %c0_19 = arith.constant 0 : index
    %c1_20 = arith.constant 1 : index
    %c0_21 = arith.constant 0 : index
    %10 = vector.load %arg3[%c0_18, %c0_19, %c1_20, %c0_21] : memref<1x9x9x4xbf16, #tpu.memory_space<vmem>>, vector<1x8x8x4xbf16>
    %11 = vector.shape_cast %10 : vector<1x8x8x4xbf16> to vector<8x8x4xbf16>
    %c0_22 = arith.constant 0 : index
    %c1_23 = arith.constant 1 : index
    %c0_24 = arith.constant 0 : index
    %c0_25 = arith.constant 0 : index
    %12 = vector.load %arg1[%c0_22, %c1_23, %c0_24, %c0_25] : memref<1x9x9x4xbf16, #tpu.memory_space<vmem>>, vector<1x8x8x4xbf16>
    %13 = vector.shape_cast %12 : vector<1x8x8x4xbf16> to vector<8x8x4xbf16>
    %c0_26 = arith.constant 0 : index
    %c1_27 = arith.constant 1 : index
    %c0_28 = arith.constant 0 : index
    %c0_29 = arith.constant 0 : index
    %14 = vector.load %arg2[%c0_26, %c1_27, %c0_28, %c0_29] : memref<1x9x9x4xbf16, #tpu.memory_space<vmem>>, vector<1x8x8x4xbf16>
    %15 = vector.shape_cast %14 : vector<1x8x8x4xbf16> to vector<8x8x4xbf16>
    %c0_30 = arith.constant 0 : index
    %c1_31 = arith.constant 1 : index
    %c1_32 = arith.constant 1 : index
    %c0_33 = arith.constant 0 : index
    %16 = vector.load %arg1[%c0_30, %c1_31, %c1_32, %c0_33] : memref<1x9x9x4xbf16, #tpu.memory_space<vmem>>, vector<1x8x8x4xbf16>
    %17 = vector.shape_cast %16 : vector<1x8x8x4xbf16> to vector<8x8x4xbf16>
    %18 = tpu.concatenate %1, %3, %5, %7, %9, %11, %13, %15, %17 in 2 : vector<8x8x4xbf16>, vector<8x8x4xbf16>, vector<8x8x4xbf16>, vector<8x8x4xbf16>, vector<8x8x4xbf16>, vector<8x8x4xbf16>, vector<8x8x4xbf16>, vector<8x8x4xbf16>, vector<8x8x4xbf16> -> vector<8x8x36xbf16>
    %19 = vector.shape_cast %18 : vector<8x8x36xbf16> to vector<64x36xbf16>
    %c0_34 = arith.constant 0 : index
    %c0_35 = arith.constant 0 : index
    %20 = vector.load %arg5[%c0_34, %c0_35] : memref<36x256xbf16, #tpu.memory_space<vmem>>, vector<36x256xbf16>
    %cst = arith.constant dense<0.000000e+00> : vector<64x256xf32>
    %21 = tpu.matmul %19, %20, %cst {dimension_numbers = #tpu.dot_dimension_numbers<[1], [0], [0], [1], [0, 0, 1, 1], [], []>} : vector<64x36xbf16>, vector<36x256xbf16>, vector<64x256xf32> -> vector<64x256xf32>
    %22 = vector.extract_strided_slice %21 {offsets = [0, 0], sizes = [64, 128], strides = [1, 1]} : vector<64x256xf32> to vector<64x128xf32>
    %23 = arith.truncf %22 : vector<64x128xf32> to vector<64x128xbf16>
    %c0_36 = arith.constant 0 : index
    %c0_37 = arith.constant 0 : index
    %c0_38 = arith.constant 0 : index
    %24 = vector.load %arg6[%c0_36, %c0_37, %c0_38] : memref<1x64x128xbf16, #tpu.memory_space<vmem>>, vector<1x64x128xbf16>
    %25 = vector.shape_cast %24 : vector<1x64x128xbf16> to vector<64x128xbf16>
    %26 = vector.shape_cast %23 : vector<64x128xbf16> to vector<1x64x128xbf16>
    tpu.vector_store %arg6[%c0_36, %c0_37, %c0_38], %26 {strides = array<i32>} : memref<1x64x128xbf16, #tpu.memory_space<vmem>>, vector<1x64x128xbf16>,
    %cst_39 = arith.constant dense<0.000000e+00> : vector<128xf32>
    %27 = vector.multi_reduction <add>, %22, %cst_39 [0] : vector<64x128xf32> to vector<128xf32>
    %28 = vector.shape_cast %27 : vector<128xf32> to vector<1x128xf32>
    %29 = arith.mulf %22, %22 : vector<64x128xf32>
    %cst_40 = arith.constant dense<0.000000e+00> : vector<128xf32>
    %30 = vector.multi_reduction <add>, %29, %cst_40 [0] : vector<64x128xf32> to vector<128xf32>
    %31 = vector.shape_cast %30 : vector<128xf32> to vector<1x128xf32>
    %32 = tpu.concatenate %28, %31 in 0 : vector<1x128xf32>, vector<1x128xf32> -> vector<2x128xf32>
    %c0_41 = arith.constant 0 : index
    %c0_42 = arith.constant 0 : index
    %c0_43 = arith.constant 0 : index
    %33 = vector.load %arg8[%c0_41, %c0_42, %c0_43] : memref<1x2x128xf32, #tpu.memory_space<vmem>>, vector<1x2x128xf32>
    %34 = vector.shape_cast %33 : vector<1x2x128xf32> to vector<2x128xf32>
    %35 = vector.shape_cast %32 : vector<2x128xf32> to vector<1x2x128xf32>
    tpu.vector_store %arg8[%c0_41, %c0_42, %c0_43], %35 {strides = array<i32>} : memref<1x2x128xf32, #tpu.memory_space<vmem>>, vector<1x2x128xf32>,
    %36 = vector.extract_strided_slice %21 {offsets = [0, 128], sizes = [64, 128], strides = [1, 1]} : vector<64x256xf32> to vector<64x128xf32>
    %37 = arith.truncf %36 : vector<64x128xf32> to vector<64x128xbf16>
    %c0_44 = arith.constant 0 : index
    %c0_45 = arith.constant 0 : index
    %c0_46 = arith.constant 0 : index
    %38 = vector.load %arg7[%c0_44, %c0_45, %c0_46] : memref<1x64x128xbf16, #tpu.memory_space<vmem>>, vector<1x64x128xbf16>
    %39 = vector.shape_cast %38 : vector<1x64x128xbf16> to vector<64x128xbf16>
    %40 = vector.shape_cast %37 : vector<64x128xbf16> to vector<1x64x128xbf16>
    tpu.vector_store %arg7[%c0_44, %c0_45, %c0_46], %40 {strides = array<i32>} : memref<1x64x128xbf16, #tpu.memory_space<vmem>>, vector<1x64x128xbf16>,
    %cst_47 = arith.constant dense<0.000000e+00> : vector<128xf32>
    %41 = vector.multi_reduction <add>, %36, %cst_47 [0] : vector<64x128xf32> to vector<128xf32>
    %42 = vector.shape_cast %41 : vector<128xf32> to vector<1x128xf32>
    %43 = arith.mulf %36, %36 : vector<64x128xf32>
    %cst_48 = arith.constant dense<0.000000e+00> : vector<128xf32>
    %44 = vector.multi_reduction <add>, %43, %cst_48 [0] : vector<64x128xf32> to vector<128xf32>
    %45 = vector.shape_cast %44 : vector<128xf32> to vector<1x128xf32>
    %46 = tpu.concatenate %42, %45 in 0 : vector<1x128xf32>, vector<1x128xf32> -> vector<2x128xf32>
    %c0_49 = arith.constant 0 : index
    %c0_50 = arith.constant 0 : index
    %c0_51 = arith.constant 0 : index
    %47 = vector.load %arg9[%c0_49, %c0_50, %c0_51] : memref<1x2x128xf32, #tpu.memory_space<vmem>>, vector<1x2x128xf32>
    %48 = vector.shape_cast %47 : vector<1x2x128xf32> to vector<2x128xf32>
    %49 = vector.shape_cast %46 : vector<2x128xf32> to vector<1x2x128xf32>
    tpu.vector_store %arg9[%c0_49, %c0_50, %c0_51], %49 {strides = array<i32>} : memref<1x2x128xf32, #tpu.memory_space<vmem>>, vector<1x2x128xf32>,
    return
  }
  func.func @transform_0(%arg0: i32) -> (i32, i32, i32, i32) {
    %c0_i32 = arith.constant 0 : i32
    %c0_i32_0 = arith.constant 0 : i32
    %c0_i32_1 = arith.constant 0 : i32
    %c0_i32_2 = arith.constant 0 : i32
    return %arg0, %c0_i32, %c0_i32_0, %c0_i32_1 : i32, i32, i32, i32
  }
  func.func @transform_1(%arg0: i32) -> (i32, i32, i32, i32) {
    %c0_i32 = arith.constant 0 : i32
    %c0_i32_0 = arith.constant 0 : i32
    %c0_i32_1 = arith.constant 0 : i32
    %c0_i32_2 = arith.constant 0 : i32
    return %arg0, %c0_i32, %c0_i32_0, %c0_i32_1 : i32, i32, i32, i32
  }
  func.func @transform_2(%arg0: i32) -> (i32, i32, i32, i32) {
    %c0_i32 = arith.constant 0 : i32
    %c0_i32_0 = arith.constant 0 : i32
    %c0_i32_1 = arith.constant 0 : i32
    %c0_i32_2 = arith.constant 0 : i32
    return %arg0, %c0_i32, %c0_i32_0, %c0_i32_1 : i32, i32, i32, i32
  }
  func.func @transform_3(%arg0: i32) -> (i32, i32, i32, i32) {
    %c0_i32 = arith.constant 0 : i32
    %c0_i32_0 = arith.constant 0 : i32
    %c0_i32_1 = arith.constant 0 : i32
    %c0_i32_2 = arith.constant 0 : i32
    return %arg0, %c0_i32, %c0_i32_0, %c0_i32_1 : i32, i32, i32, i32
  }
  func.func @transform_4(%arg0: i32) -> (i32, i32) {
    %c0_i32 = arith.constant 0 : i32
    %c0_i32_0 = arith.constant 0 : i32
    %c0_i32_1 = arith.constant 0 : i32
    return %c0_i32, %c0_i32_0 : i32, i32
  }
  func.func @transform_5(%arg0: i32) -> (i32, i32, i32) {
    %c0_i32 = arith.constant 0 : i32
    %c0_i32_0 = arith.constant 0 : i32
    %c0_i32_1 = arith.constant 0 : i32
    return %arg0, %c0_i32, %c0_i32_0 : i32, i32, i32
  }
  func.func @transform_6(%arg0: i32) -> (i32, i32, i32) {
    %c0_i32 = arith.constant 0 : i32
    %c0_i32_0 = arith.constant 0 : i32
    %c0_i32_1 = arith.constant 0 : i32
    return %arg0, %c0_i32, %c0_i32_0 : i32, i32, i32
  }
  func.func @transform_7(%arg0: i32) -> (i32, i32, i32) {
    %c0_i32 = arith.constant 0 : i32
    %c0_i32_0 = arith.constant 0 : i32
    %c0_i32_1 = arith.constant 0 : i32
    return %arg0, %c0_i32, %c0_i32_0 : i32, i32, i32
  }
  func.func @transform_8(%arg0: i32) -> (i32, i32, i32) {
    %c0_i32 = arith.constant 0 : i32
    %c0_i32_0 = arith.constant 0 : i32
    %c0_i32_1 = arith.constant 0 : i32
    return %arg0, %c0_i32, %c0_i32_0 : i32, i32, i32
  }
}

</mosaic_0001>

<bundles_post_ra>
// kernel: tpu_custom_call.1
= control target key start
LH: loop header
LB: loop body
LE: loop exit
PB: predicated region body
PF: predicated region fallthrough
CT: control target
= control target key end

     0   :  { %s3319_s0 = inlined_call_operand.hbm [shape: bf16[2,9,9,4], index: 0, kind: input, shape index: {}]   ;;  %s3320_s1 = inlined_call_operand.hbm [shape: bf16[2,9,9,4], index: 1, kind: input, shape index: {}]   ;;  %s3321_s2 = inlined_call_operand.hbm [shape: bf16[2,9,9,4], index: 2, kind: input, shape index: {}]   ;;  %s3322_s3 = inlined_call_operand.hbm [shape: bf16[2,9,9,4], index: 3, kind: input, shape index: {}]   ;;  %s3323_s4 = inlined_call_operand.hbm [shape: bf16[36,256], index: 4, kind: input, shape index: {}]   ;;  %s3324_s5 = inlined_call_operand.hbm [shape: bf16[2,64,128], index: 5, kind: output, shape index: {0}]   ;;  %s3325_s6 = inlined_call_operand.hbm [shape: bf16[2,64,128], index: 6, kind: output, shape index: {1}]   ;;  %s3326_s7 = inlined_call_operand.hbm [shape: f32[2,2,128], index: 7, kind: output, shape index: {2}]   ;;  %s3327_s8 = inlined_call_operand.hbm [shape: f32[2,2,128], index: 8, kind: output, shape index: {3}]  }
   0x1   :  { %3341 = sst [smem:[#allocation28_spill]] %s3320_s1 }
   0x2   :  { %3342 = sst [smem:[#allocation29_spill]] %s3323_s4 }
   0x3   :  { %14 = vsyncpa [#allocation3], 0 }
   0x4   :  { %16 = vsyncpa [#allocation3 + $0x1], 0 }
   0x5   :  { %17 = vsyncpa [#allocation6], 0 }
   0x6   :  { %19 = vsyncpa [#allocation6 + $0x1], 0 }
   0x7   :  { %20 = vsyncpa [#allocation9], 0 }
   0x8   :  { %22 = vsyncpa [#allocation9 + $0x1], 0 }
   0x9   :  { %23 = vsyncpa [#allocation4], 0 }
   0xa   :  { %25 = vsyncpa [#allocation4 + $0x1], 0 }
   0xb   :  { %26 = vsyncpa [#allocation13], 0 }
   0xc   :  { %28 = vsyncpa [#allocation13 + $0x1], 0 }
   0xd   :  { %29 = vsyncpa [#allocation16], 0 }
   0xe   :  { %31 = vsyncpa [#allocation16 + $0x1], 0  ;;  %s2599_s27 = smov 0   ;;  %s2601_s28 = smov 0  }
   0xf   :  { %s2603_s29 = smov 0   ;;  %s2605_s30 = smov 0  }
  0x10 LB: > { %3343 = sst [smem:[#allocation24_spill]] %s2517_s27  ;;  %s2620_s9 = sadd.s32 4294967295, %s2529_s30   ;;  %s2529_s30 = sphi %s2605_s30, %s3372_s30   ;;  %s2525_s29 = sphi %s2603_s29, %s3376_s29   ;;  %s2521_s28 = sphi %s2601_s28, %s3375_s28   ;;  %s2517_s27 = sphi %s2599_s27, %s3374_s27  }
  0x11   : > { %s3328_s10 = sadd.s32 4294967294, %s2529_s30   ;;  %s2624_s11 = sadd.s32 1, %s2529_s30  }
  0x12   : > { %3344 = sst [smem:[#allocation25_spill]] %s2624_s11  ;;  %s44_s12 = sadd.s32 1, %s2525_s29 }
  0x13   : > { %s41_s13 = ssub.s32 %s2529_s30, %s2624_s11  ;;  %p51_p0 = scmp.ne.s32.totalorder %s2525_s29, %s2521_s28 }
  0x14   : > { %p42_p1 = scmp.eq.s32.totalorder %s41_s13, 0  ;;  %p52_p2 = scmp.eq.s32.totalorder %s2529_s30, 0 }
  0x15   : > { %p57_p3 = scmp.ne.s32.totalorder %s2521_s28, %s2517_s27  ;;  %p3330_p4 = scmp.eq.s32.totalorder %s2620_s9, 0 }
  0x16   : > { %s2636_s14 = scalar_select %p42_p1, %s2525_s29, %s44_s12  }
  0x17   : > { %p2638_p5 = por %p52_p2, %p51_p0  ;;  %p2644_p6 = por %p3330_p4, %p57_p3 }
  0x18   : > { %3345 = sst [smem:[#allocation26_spill]] %s2636_s14  ;;  %p180_p7 = scmp.eq.s32.totalorder %s2620_s9, 1 }
  0x19   : > { %s3346_s15 = scalar_select %p2638_p5, 1, 0 }
  0x1a   : > { %s3347_s16 = scalar_select %p2644_p6, 1, 0 }
  0x1b   : > { %p186_p8 = scmp.eq.s32.totalorder %s3328_s10, 1  ;;  %p1815_p9 = scmp.ge.s32.totalorder %s2529_s30, 1 }
  0x1c   : > { %p271_p10 = scmp.lt.s32.totalorder %s2529_s30, 3  ;;  %p2653_p11 = por %p180_p7, %p51_p0 }
  0x1d   : > { %p2657_p12 = por %p186_p8, %p57_p3  ;;  %s2531_s20 = smov [#allocation10]  }
  0x1e   : > { %s3348_s17 = scalar_select %p2653_p11, 1, 0 }
  0x1f   : > { %s3349_s18 = scalar_select %p2657_p12, 1, 0 }
  0x20   : > { %p2661_p13 = pnand %p1815_p9, %p271_p10  ;;  %s283_s21 = sshll.u32 %s2531_s20, 4  ;;  %s284_s21 = int_to_ptr.vmem [resolvable:$true] %s283_s21 }
  0x21   : > { %3350 = sst [smem:[#allocation27_spill]] %s3349_s18  ;;  %s3329_s23 = sand.u32 1, %s2525_s29  }
  0x22   : > { %s3351_s19 = scalar_select %p2661_p13, 1, 0 }
  0x23   : > { %p2058_p1 = pneg %p2661_p13  ;;  %s2678_s24 = smul.u32 72, %s3329_s23 }
  0x24   : > { %s3353_s4 = sld [smem:[#allocation29_spill]] }
  0x25   : > { %p2669_p2 = pnand %p2058_p1, %p3330_p4 }
  0x27   : > { %p2213_p8 = pneg %p2669_p2 }
  0x2a   : > { %s2211_s12 = scalar_lea.hbm %s3353_s4, 640 }
  0x2b   : > { %p2212_p7 = scmp.ne.s32.totalorder %s3353_s4, %s2211_s12  ;;  %p2218_p1 = scmp.lt.u32.totalorder %s2211_s12, %s3353_s4 }
  0x2d   : > { %p2214_p9 = pnand %p2213_p8, %p2212_p7 }
  0x2f   : > { %p2215_p10 = pneg %p2214_p9 }
  0x31   : > { %p2220_p0 = pnand %p2218_p1, %p2215_p10 }
  0x33   : > { %2223 = shalt.err (!%p2220_p0)
}
  0x34   : > { %s2224_s23 = scalar_lea.vmem %s284_s21, 640  ;;  %p2232_p11 = scmp.lt.s32.totalorder %s284_s21, %s284_s21 }
  0x35   : > { %p2225_p4 = scmp.ne.s32.totalorder %s284_s21, %s2224_s23  ;;  %p2233_p6 = scmp.lt.s32.totalorder %s2224_s23, %s2224_s23 }
  0x37   : > { %p2227_p3 = pnand %p2225_p4, %p2213_p8  ;;  %p2234_p13 = por %p2233_p6, %p2232_p11 }
  0x39   : > { %p2228_p12 = pneg %p2227_p3 }
  0x3b   : > { %p2235_p5 = pnand %p2234_p13, %p2228_p12 }
  0x3d   : > { %2238 = shalt.err (!%p2235_p5)
}
  0x3e   : > { %s2532_s10 = smov 128   ;;  %s2533_s14 = smov 8  }
  0x3f   : > { %2061 = dma.hbm_to_vmem [thread:$0]  (!%p2669_p2), %s3353_s4, 640, %s284_s21, [#allocation9], %s2532_s10, %s2532_s10, %s2533_s14  }
  0x40   : > { %s2697_s12 = smul.u32 1152, %s2529_s30  ;;  %p3354_p4 = scmp.ne.s32.totalorder %s3346_s15, 0 }
  0x41   : > { %p3355_p6 = scmp.lt.s32.totalorder %s2529_s30, 2  ;;  %s3337_s13 = sand.u32 1, %s2529_s30  }
  0x42   : > { %s3357_s1 = sld [smem:[#allocation28_spill]]  ;;  %s322_s21 = scalar_lea.vmem [#allocation5], %s2678_s24 }
  0x43   : > { %p2703_p5 = pnand %p3355_p6, %p3354_p4  ;;  %s329_s22 = sshll.u32 %s322_s21, 4  ;;  %s2715_s22 = int_to_ptr.vmem [resolvable:$true] %s329_s22 }
  0x44   : > { %s2719_s15 = scalar_lea.sflag [#allocation6], %s3337_s13 }
  0x45   : > { %p2725_p12 = pneg %p2703_p5 }
  0x48   : > { %s2712_s18 = scalar_lea.hbm %s3357_s1, %s2697_s12  ;;  %s2244_s26 = scalar_lea.hbm %s3357_s1, 2304 }
  0x49   : > { %s2239_s10 = scalar_lea.hbm %s2712_s18, 1152  ;;  %p2245_p0 = scmp.lt.u32.totalorder %s2712_s18, %s3357_s1 }
  0x4a   : > { %p2240_p11 = scmp.ne.s32.totalorder %s2712_s18, %s2239_s10  ;;  %p2246_p3 = scmp.lt.u32.totalorder %s2244_s26, %s2239_s10 }
  0x4b   : > { %p2248_p8 = scmp.lt.u32.totalorder %s2239_s10, %s2712_s18 }
  0x4c   : > { %p2242_p13 = pnand %p2725_p12, %p2240_p11  ;;  %p2247_p7 = por %p2246_p3, %p2245_p0 }
  0x4e   : > { %p2243_p2 = pneg %p2242_p13  ;;  %p2249_p9 = por %p2248_p8, %p2247_p7 }
  0x50   : > { %p2250_p10 = pnand %p2249_p9, %p2243_p2 }
  0x52   : > { %2253 = shalt.err (!%p2250_p10)
}
  0x53   : > { %s2254_s13 = scalar_lea.vmem %s2715_s22, 1152  ;;  %s2534_s11 = smov [#allocation5]  }
  0x54   : > { %p2255_p1 = scmp.ne.s32.totalorder %s2715_s22, %s2254_s13  ;;  %s2259_s25 = sshll.u32 %s2534_s11, 4  ;;  %s2260_s25 = int_to_ptr.vmem [resolvable:$false] %s2259_s25 }
  0x55   : > { %s2261_s20 = scalar_lea.vmem %s2260_s25, 2304  ;;  %p2262_p11 = scmp.lt.s32.totalorder %s2715_s22, %s2260_s25 }
  0x56   : > { %p2257_p4 = pnand %p2255_p1, %p2725_p12  ;;  %p2263_p13 = scmp.lt.s32.totalorder %s2261_s20, %s2254_s13 }
  0x58   : > { %p2258_p6 = pneg %p2257_p4  ;;  %p2264_p0 = por %p2263_p13, %p2262_p11 }
  0x5a   : > { %p2265_p3 = pnand %p2264_p0, %p2258_p6 }
  0x5c   : > { %2268 = shalt.err (!%p2265_p3)
}
  0x5d   : > { %s3339_s10 = smov 64   ;;  %s2536_s26 = smov 4  }
  0x5e   : > { %2068 = dma.hbm_to_vmem [thread:$0]  (!%p2703_p5), %s2712_s18, 1152, %s2715_s22, %s2719_s15, %s3339_s10, %s3339_s10, %s2536_s26  }
  0x5f   : > { %s2756_s11 = scalar_lea.hbm %s3319_s0, %s2697_s12  ;;  %s301_s25 = scalar_lea.vmem [#allocation2], %s2678_s24 }
  0x60   : > { %s308_s20 = sshll.u32 %s301_s25, 4  ;;  %s3359_s1 = sand.u32 1, %s2525_s29   ;;  %s2759_s20 = int_to_ptr.vmem [resolvable:$true] %s308_s20 }
  0x61   : > { %s2763_s4 = scalar_lea.sflag [#allocation3], %s3359_s1  ;;  %s2269_s27 = scalar_lea.hbm %s2756_s11, 1152 }
  0x62   : > { %p2270_p2 = scmp.ne.s32.totalorder %s2756_s11, %s2269_s27  ;;  %s2274_s21 = scalar_lea.hbm %s3319_s0, 2304 }
  0x63   : > { %p2275_p9 = scmp.lt.u32.totalorder %s2756_s11, %s3319_s0  ;;  %p2276_p10 = scmp.lt.u32.totalorder %s2274_s21, %s2269_s27 }
  0x64   : > { %p2272_p7 = pnand %p2270_p2, %p2725_p12  ;;  %p2278_p4 = scmp.lt.u32.totalorder %s2269_s27, %s2756_s11 }
  0x65   : > { %p2277_p1 = por %p2276_p10, %p2275_p9 }
  0x66   : > { %p2273_p8 = pneg %p2272_p7 }
  0x67   : > { %p2279_p6 = por %p2278_p4, %p2277_p1 }
  0x69   : > { %p2280_p11 = pnand %p2279_p6, %p2273_p8 }
  0x6b   : > { %2283 = shalt.err (!%p2280_p11)
}
  0x6c   : > { %s2284_s1 = scalar_lea.vmem %s2759_s20, 1152  ;;  %s2537_s25 = smov [#allocation2]  }
  0x6d   : > { %p2285_p13 = scmp.ne.s32.totalorder %s2759_s20, %s2284_s1  ;;  %s2289_s18 = sshll.u32 %s2537_s25, 4  ;;  %s2290_s18 = int_to_ptr.vmem [resolvable:$false] %s2289_s18 }
  0x6e   : > { %s2291_s10 = scalar_lea.vmem %s2290_s18, 2304  ;;  %p2292_p2 = scmp.lt.s32.totalorder %s2759_s20, %s2290_s18 }
  0x6f   : > { %p2287_p0 = pnand %p2285_p13, %p2725_p12  ;;  %p2293_p7 = scmp.lt.s32.totalorder %s2291_s10, %s2284_s1 }
  0x71   : > { %p2288_p3 = pneg %p2287_p0  ;;  %p2294_p9 = por %p2293_p7, %p2292_p2 }
  0x73   : > { %p2295_p10 = pnand %p2294_p9, %p2288_p3 }
  0x75   : > { %2298 = shalt.err (!%p2295_p10)
}
  0x76   : > { %s3360_s27 = smov 64   ;;  %s2794_s13 = scalar_lea.hbm %s3321_s2, %s2697_s12 }
  0x77   : > { %2065 = dma.hbm_to_vmem [thread:$0]  (!%p2703_p5), %s2756_s11, 1152, %s2759_s20, %s2763_s4, %s3360_s27, %s3360_s27, %s2536_s26  }
  0x78   : > { %s343_s1 = scalar_lea.vmem [#allocation7], %s2678_s24  ;;  %s2299_s18 = scalar_lea.hbm %s2794_s13, 1152 }
  0x79   : > { %s350_s25 = sshll.u32 %s343_s1, 4  ;;  %p2300_p8 = scmp.ne.s32.totalorder %s2794_s13, %s2299_s18  ;;  %s2797_s25 = int_to_ptr.vmem [resolvable:$true] %s350_s25 }
  0x7a   : > { %s2304_s11 = scalar_lea.hbm %s3321_s2, 2304  ;;  %p2305_p6 = scmp.lt.u32.totalorder %s2794_s13, %s3321_s2 }
  0x7b   : > { %p2302_p1 = pnand %p2300_p8, %p2725_p12  ;;  %p2306_p11 = scmp.lt.u32.totalorder %s2304_s11, %s2299_s18 }
  0x7c   : > { %p2308_p0 = scmp.lt.u32.totalorder %s2299_s18, %s2794_s13 }
  0x7d   : > { %p2303_p4 = pneg %p2302_p1  ;;  %p2307_p13 = por %p2306_p11, %p2305_p6 }
  0x7f   : > { %p2309_p3 = por %p2308_p0, %p2307_p13 }
  0x81   : > { %p2310_p2 = pnand %p2309_p3, %p2303_p4 }
  0x83   : > { %2313 = shalt.err (!%p2310_p2)
}
  0x84   : > { %s2314_s21 = scalar_lea.vmem %s2797_s25, 1152  ;;  %s2538_s1 = smov [#allocation7]  }
  0x85   : > { %p2315_p7 = scmp.ne.s32.totalorder %s2797_s25, %s2314_s21  ;;  %s2319_s10 = sshll.u32 %s2538_s1, 4  ;;  %s2320_s10 = int_to_ptr.vmem [resolvable:$false] %s2319_s10 }
  0x86   : > { %s2321_s4 = scalar_lea.vmem %s2320_s10, 2304  ;;  %p2322_p8 = scmp.lt.s32.totalorder %s2797_s25, %s2320_s10 }
  0x87   : > { %p2317_p9 = pnand %p2315_p7, %p2725_p12  ;;  %p2323_p1 = scmp.lt.s32.totalorder %s2321_s4, %s2314_s21 }
  0x89   : > { %p2318_p10 = pneg %p2317_p9  ;;  %p2324_p6 = por %p2323_p1, %p2322_p8 }
  0x8b   : > { %p2325_p11 = pnand %p2324_p6, %p2318_p10 }
  0x8d   : > { %2328 = shalt.err (!%p2325_p11)
}
  0x8e   : > { %2071 = dma.hbm_to_vmem [thread:$0]  (!%p2703_p5), %s2794_s13, 1152, %s2797_s25, %s2719_s15, %s3360_s27, %s3360_s27, %s2536_s26  }
  0x8f   : > { %s2828_s20 = scalar_lea.hbm %s3322_s3, %s2697_s12  ;;  %s364_s22 = scalar_lea.vmem [#allocation8], %s2678_s24 }
  0x90   : > { %s371_s21 = sshll.u32 %s364_s22, 4  ;;  %s3361_s1 = sand.u32 1, %s2529_s30   ;;  %s2831_s21 = int_to_ptr.vmem [resolvable:$true] %s371_s21 }
  0x91   : > { %s2835_s10 = scalar_lea.sflag [#allocation9], %s3361_s1  ;;  %s2329_s4 = scalar_lea.hbm %s2828_s20, 1152 }
  0x92   : > { %p2330_p4 = scmp.ne.s32.totalorder %s2828_s20, %s2329_s4  ;;  %s2334_s12 = scalar_lea.hbm %s3322_s3, 2304 }
  0x93   : > { %p2335_p3 = scmp.lt.u32.totalorder %s2828_s20, %s3322_s3  ;;  %p2336_p2 = scmp.lt.u32.totalorder %s2334_s12, %s2329_s4 }
  0x94   : > { %p2332_p13 = pnand %p2330_p4, %p2725_p12  ;;  %p2338_p9 = scmp.lt.u32.totalorder %s2329_s4, %s2828_s20 }
  0x95   : > { %p2337_p7 = por %p2336_p2, %p2335_p3 }
  0x96   : > { %p2333_p0 = pneg %p2332_p13 }
  0x97   : > { %p2339_p10 = por %p2338_p9, %p2337_p7 }
  0x99   : > { %p2340_p8 = pnand %p2339_p10, %p2333_p0 }
  0x9b   : > { %2343 = shalt.err (!%p2340_p8)
}
  0x9c   : > { %s2344_s24 = scalar_lea.vmem %s2831_s21, 1152  ;;  %s2539_s11 = smov [#allocation8]  }
  0x9d   : > { %p2345_p1 = scmp.ne.s32.totalorder %s2831_s21, %s2344_s24  ;;  %s2349_s22 = sshll.u32 %s2539_s11, 4  ;;  %s2350_s22 = int_to_ptr.vmem [resolvable:$false] %s2349_s22 }
  0x9e   : > { %s2351_s1 = scalar_lea.vmem %s2350_s22, 2304  ;;  %p2352_p4 = scmp.lt.s32.totalorder %s2831_s21, %s2350_s22 }
  0x9f   : > { %p2347_p6 = pnand %p2345_p1, %p2725_p12  ;;  %p2353_p13 = scmp.lt.s32.totalorder %s2351_s1, %s2344_s24 }
  0xa1   : > { %p2348_p11 = pneg %p2347_p6  ;;  %p2354_p3 = por %p2353_p13, %p2352_p4 }
  0xa3   : > { %p2355_p2 = pnand %p2354_p3, %p2348_p11 }
  0xa5   : > { %2358 = shalt.err (!%p2355_p2)
}
  0xa6   : > { %2074 = dma.hbm_to_vmem [thread:$0]  (!%p2703_p5), %s2828_s20, 1152, %s2831_s21, %s2835_s10, %s3360_s27, %s3360_s27, %s2536_s26  }
  0xa7   : > { %p3362_p12 = scmp.ne.s32.totalorder %s3351_s19, 0 }
  0xa8   : > { %s2865_s14 = sand.u32 (!%p3362_p12), 1, %s2521_s28   ;;  %p3363_p0 = scmp.ne.s32.totalorder (!%p3362_p12), %s3347_s16, 0 }
  0xa9   : > { %383 = sbr.rel (%p3362_p12) target bundleno = 735 (0x2df), region = 40  ;;  %s386_s15 = scalar_lea.sflag (!%p3362_p12), [#allocation3], %s2865_s14 }
  0xaa   : > { %s2037_s4 = smul.u32 (!%p3362_p12), 72, %s2865_s14 }
  0xac   : > { %s2869_s13 = scalar_lea.vmem (!%p3362_p12), [#allocation2], %s2037_s4 }
  0xb0   : > { %2488 = dma.done.wait (%p3363_p0), %s386_s15, 1152  }
  0xb1   : > { %2490 = vsyncadd (%p3363_p0), %s386_s15, 4294966144  ;;  %s2876_s23 = sand.u32 1, %s2620_s9   ;;  %s2879_s26 = scalar_lea.vmem [#allocation5], %s2037_s4 }
  0xb2   : > { %s395_s19 = scalar_lea.sflag [#allocation6], %s2876_s23 }
  0xb3   : > { %2492 = dma.done.wait (%p3363_p0), %s395_s19, 2304  }
  0xb4   : > { %2494 = vsyncadd (%p3363_p0), %s395_s19, 4294964992  ;;  %s2885_s27 = scalar_lea.vmem [#allocation7], %s2037_s4  ;;  %s413_s20 = scalar_lea.sflag [#allocation9], %s2876_s23 }
  0xb5   : > { %s2888_s21 = scalar_lea.vmem [#allocation8], %s2037_s4 }
  0xb6   : > { %2496 = dma.done.wait (%p3363_p0), %s413_s20, 1152  }
  0xb7   : > { %2498 = vsyncadd (%p3363_p0), %s413_s20, 4294966144  ;;  %p3364_p5 = scmp.eq.s32.totalorder %s2620_s9, 0 }
  0xb9   : > { %2500 = dma.done.wait (%p3364_p5), [#allocation9], 640   ;;  %p3365_p7 = pmov %p3364_p5 }
  0xba   : > { %v509_v0 = vld [vmem:[%s2885_s27 + $0x8] sm:$0xf]  ;;  %v525_v1 = vld [vmem:[%s2885_s27 + $0xc] sm:$0x1]  ;;  %v2141_v3 = vld [vmem:[%s2879_s26] ss:$0 sps:$4 sm:$0xff]  }
  0xbb   : > { %2502 = vsyncadd (%p3365_p7), [#allocation9], 4294966656  ;;  %v1869_v2 = vcombine.low %v509_v0, %v509_v0  ;;  %v2142_v4 = vld [vmem:[%s2888_s21 + $0x8] ss:$0 sps:$4 sm:$0xff]   ;;  %v508_v6 = vld [vmem:[%s2885_s27] sm:$0xf]  ;;  %v1885_v11 = vcombine.low %v509_v0, %v525_v1 }
  0xbc   : > { %v2143_v5 = vld [vmem:[%s2879_s26 + $0x8] ss:$0 sps:$4 sm:$0xff]   ;;  %s2540_s16 = smov 12   ;;  %s2541_s10 = smov 4   ;;  %v524_v7 = vld [vmem:[%s2885_s27 + $0x4] sm:$0x1]  ;;  %v1868_v16 = vcombine.low %v508_v6, %v508_v6 }
  0xbd   : > { %736 = vrot.lane.b32.xlu1 %v1869_v2, %s2540_s16  ;;  %582 = vrot.lane.b32.xlu0 %v2141_v3, %s2541_s10  ;;  %v2908_v8 = vld [vmem:[%s2869_s13] sm:$0xf]  ;;  %v1884_v9 = vcombine.low %v508_v6, %v524_v7  ;;  %v500_v10 = vld [vmem:[%s2869_s13 + $0x4] sm:$0x1]  ;;  %s2542_s12 = smov 16   ;;  %v824_v21 = vshll.u32 %v1885_v11, 16 }
  0xbe   : > { %v1860_v12 = vcombine.low %v2908_v8, %v500_v10  ;;  %v2913_v13 = vld [vmem:[%s2869_s13 + $0x8] sm:$0xf]  ;;  %v501_v14 = vld [vmem:[%s2869_s13 + $0xc] sm:$0x1]  ;;  %v2147_v26 = vld [vmem:[%s2888_s21] ss:$0 sps:$4 sm:$0xff]  }
  0xbf   : > { %v1861_v15 = vcombine.low %v2913_v13, %v501_v14  ;;  %v817_v19 = vshll.u32 %v1884_v9, 16  ;;  %v815_v27 = vshrl.u32 %v1884_v9, 16  ;;  %v1844_v29 = vld [vmem:[%s2869_s13 + $0xc] sm:$0x1]  ;;  %v822_v30 = vshrl.u32 %v1885_v11, 16  ;;  %s2543_s25 = smov 8  }
  0xc0   : > { %v639_v17 = vshrl.u32 %v1860_v12, 16  ;;  %v641_v18 = vshll.u32 %v1860_v12, 16  ;;  %v826_v32 = vrot.slane %v824_v21, 1  ;;  %v1828_v33 = vld [vmem:[%s2869_s13 + $0x8] sm:$0xf]  ;;  %s2544_s18 = smov 20  }
  0xc1   : > { %776 = vrot.lane.b32.xlu1 %v2142_v4, %s2542_s12  ;;  %584 = vrot.lane.b32.xlu0 %v2143_v5, %s2541_s10  ;;  %v648_v20 = vshll.u32 %v1861_v15, 16  ;;  %v646_v23 = vshrl.u32 %v1861_v15, 16  ;;  %v819_v28 = vrot.slane %v817_v19, 1  ;;  %v1845_v34 = vld [vmem:[%s2869_s13 + $0x14] sm:$0x1]  ;;  %v1908_v36 = vcombine.low %v1828_v33, %v1844_v29  ;;  %s2545_s24 = smov 24  }
  0xc2   : > { %v643_v22 = vrot.slane %v641_v18, 1  ;;  %v1829_v37 = vld [vmem:[%s2869_s13 + $0x10] sm:$0xf]  ;;  %v827_v38 = vor.u32 %v826_v32, %v822_v30  ;;  %v1892_v40 = vcombine.low %v1828_v33, %v1828_v33  ;;  %v2153_v44 = vld [vmem:[%s2879_s26 + $0x8] ss:$0 sps:$4 sm:$0xff]   ;;  %s2546_s11 = smov 28  }
  0xc3   : > { %v650_v24 = vrot.slane %v648_v20, 1  ;;  %v820_v35 = vor.u32 %v819_v28, %v815_v27  ;;  %v1909_v39 = vcombine.low %v1829_v37, %v1845_v34  ;;  %v993_v41 = vshll.u32 %v1908_v36, 16  ;;  %v2933_v47 = vld [vmem:[%s2869_s13 + $0x10] sm:$0xf]  ;;  %v502_v48 = vld [vmem:[%s2869_s13 + $0x14] sm:$0x1] }
  0xc4   : > { %v644_v25 = vor.u32 %v643_v22, %v639_v17  ;;  %v1893_v42 = vcombine.low %v1829_v37, %v1829_v37  ;;  %v991_v45 = vshrl.u32 %v1908_v36, 16  ;;  %v2154_v49 = vld [vmem:[%s2879_s26 + $0x10] ss:$0 sps:$4 sm:$0xff]   ;;  %v2939_v52 = vld [vmem:[%s2869_s13 + $0x18] sm:$0xf]  ;;  %v1862_v55 = vcombine.low %v2933_v47, %v502_v48  ;;  %s2547_s22 = smov 32  }
  0xc5   : > { %734 = vrot.lane.b32.xlu0 %v1868_v16, %s2540_s16  ;;  %v651_v31 = vor.u32 %v650_v24, %v646_v23  ;;  %v1000_v43 = vshll.u32 %v1909_v39, 16  ;;  %v995_v46 = vrot.slane %v993_v41, 1  ;;  %v998_v50 = vshrl.u32 %v1909_v39, 16  ;;  %v503_v53 = vld [vmem:[%s2869_s13 + $0x1c] sm:$0x1]  ;;  %s1824_s1 = sshll.u32 %s2865_s14, 5 }
  0xc6   : > { %694 = vrot.lane.b32.xlu1 %v644_v25, %s2543_s25  ;;  %v2945_v56 = vld [vmem:[%s2869_s13 + $0x20] sm:$0xf]  ;;  %v504_v57 = vld [vmem:[%s2869_s13 + $0x24] sm:$0x1]  ;;  %v1863_v59 = vcombine.low %v2939_v52, %v503_v53  ;;  %v2951_v60 = vld [vmem:[%s2869_s13 + $0x28] sm:$0xf] }
  0xc7   : > { %v1002_v51 = vrot.slane %v1000_v43, 1  ;;  %v996_v54 = vor.u32 %v995_v46, %v991_v45  ;;  %v505_v61 = vld [vmem:[%s2869_s13 + $0x2c] sm:$0x1]  ;;  %v2155_v62 = vld [vmem:[%s2879_s26 + $0x10] ss:$0 sps:$4 sm:$0xff]   ;;  %v655_v63 = vshll.u32 %v1862_v55, 16  ;;  %v1864_v0 = vcombine.low %v2945_v56, %v504_v57 }
  0xc8   : > { %v2156_v1 = vld [vmem:[%s2879_s26 + $0x18] ss:$0 sps:$4 sm:$0xff]   ;;  %v662_v2 = vshll.u32 %v1863_v59, 16  ;;  %v1865_v3 = vcombine.low %v2951_v60, %v505_v61  ;;  %v2157_v4 = vld [vmem:[%s2879_s26 + $0x20] ss:$0 sps:$4 sm:$0xff]   ;;  %v653_v5 = vshrl.u32 %v1862_v55, 16 }
  0xc9   : > { %774 = vrot.lane.b32.xlu0 %v2147_v26, %s2542_s12  ;;  %v1003_v58 = vor.u32 %v1002_v51, %v998_v50  ;;  %v657_v6 = vrot.slane %v655_v63, 1  ;;  %v669_v7 = vshll.u32 %v1864_v0, 16  ;;  %v2158_v9 = vld [vmem:[%s2879_s26 + $0x28] ss:$0 sps:$4 sm:$0xff]   ;;  %v660_v10 = vshrl.u32 %v1863_v59, 16  ;;  %s3139_s4 = scalar_lea.vmem [#allocation11], %s1824_s1 }
  0xca   : > { %696 = vrot.lane.b32.xlu1 %v651_v31, %s2543_s25  ;;  %v664_v11 = vrot.slane %v662_v2, 1  ;;  %v676_v12 = vshll.u32 %v1865_v3, 16  ;;  %v667_v15 = vshrl.u32 %v1864_v0, 16  ;;  %v674_v18 = vshrl.u32 %v1865_v3, 16  ;;  %v510_v21 = vld [vmem:[%s2885_s27 + $0x10] sm:$0xf] }
  0xcb   : > { %v658_v14 = vor.u32 %v657_v6, %v653_v5  ;;  %v671_v16 = vrot.slane %v669_v7, 1  ;;  %v2548_v22 = vmov 0   ;;  %v511_v24 = vld [vmem:[%s2885_s27 + $0x18] sm:$0xf]  ;;  %v2203_v25 = vld [vmem:[#allocation10 + $0x4] ss:$8 sps:$4 sm:$0xff]   ;;  %v1870_v27 = vcombine.low %v510_v21, %v510_v21 }
  0xcc   : > { %v665_v17 = vor.u32 %v664_v11, %v660_v10  ;;  %v678_v19 = vrot.slane %v676_v12, 1  ;;  %1308 = vmatprep.mubr.bf16.mxu0 %v2548_v22  ;;  %1328 = vmatprep.mubr.bf16.mxu1 %v2548_v22  ;;  %v2205_v26 = vld [vmem:[#allocation10] ss:$8 sps:$4 sm:$0xff]   ;;  %v2206_v28 = vld [vmem:[#allocation10 + $0x14] ss:$8 sps:$4 sm:$0xff]   ;;  %v1871_v32 = vcombine.low %v511_v24, %v511_v24  ;;  %vm1269_vm0 = vcmask 1041408  }
  0xcd   : > { %870 = vrot.lane.b32.xlu0 %v820_v35, %s2544_s18  ;;  %v672_v20 = vor.u32 %v671_v16, %v667_v15  ;;  %v526_v29 = vld [vmem:[%s2885_s27 + $0x14] sm:$0x1]  ;;  %v512_v30 = vld [vmem:[%s2885_s27 + $0x20] sm:$0xf]  ;;  %1276 = vmatprep.subr.bf16.mxu0 %v2203_v25  ;;  %v2208_v33 = vld [vmem:[#allocation10 + $0x10] ss:$8 sps:$4 sm:$0xff]  }
  0xce   : > { %872 = vrot.lane.b32.xlu1 %v827_v38, %s2544_s18  ;;  %v679_v23 = vor.u32 %v678_v19, %v674_v18  ;;  %v1210_v31 = vld [vmem:[#allocation10 + $0x20] sm:$0x33]  ;;  %2023 = vmatprep.subr.bf16.mxu1 %v2203_v25  ;;  %v513_v35 = vld [vmem:[%s2885_s27 + $0x28] sm:$0xf]  ;;  %v1886_v38 = vcombine.low %v510_v21, %v526_v29  ;;  %v1872_v39 = vcombine.low %v512_v30, %v512_v30  ;;  %v529_v43 = vld [vmem:[%s2885_s27 + $0x2c] sm:$0x1] }
  0xcf   : > { %1277 = vmatpush1.bf16.msra.mxu0 %v2205_v26  ;;  %v527_v34 = vld [vmem:[%s2885_s27 + $0x1c] sm:$0x1]  ;;  %v1925_v36 = vcombine.high %v1210_v31, %v1210_v31  ;;  %v1924_v37 = vcombine.low %v1210_v31, %v1210_v31  ;;  %2026 = vmatpush1.bf16.msra.mxu1 %v2205_v26  ;;  %v2171_v46 = vld [vmem:[%s2888_s21 + $0x10] ss:$0 sps:$4 sm:$0xff]   ;;  %v2172_v50 = vld [vmem:[%s2888_s21 + $0x18] ss:$0 sps:$4 sm:$0xff]  }
  0xd0   : > { %1278 = vmatprep.subr.bf16.mxu0 %v2206_v28  ;;  %2024 = vmatprep.subr.bf16.mxu1 %v2206_v28  ;;  %v1887_v41 = vcombine.low %v511_v24, %v527_v34  ;;  %v831_v48 = vshll.u32 %v1886_v38, 16  ;;  %v2173_v53 = vld [vmem:[%s2888_s21 + $0x20] ss:$0 sps:$4 sm:$0xff]   ;;  %v1830_v6 = vld [vmem:[%s2869_s13 + $0x18] sm:$0xf]  ;;  %vm1062_vm1 = vcmask 31744  }
  0xd1   : > { %910 = vrot.lane.b32.xlu0 %v1892_v40, %s2545_s24  ;;  %v528_v40 = vld [vmem:[%s2885_s27 + $0x24] sm:$0x1]  ;;  %v1894_v10 = vcombine.low %v1830_v6, %v1830_v6  ;;  %v1846_v11 = vld [vmem:[%s2869_s13 + $0x1c] sm:$0x1]  ;;  %v1832_v12 = vld [vmem:[%s2869_s13 + $0x28] sm:$0xf] }
  0xd2   : > { %912 = vrot.lane.b32.xlu1 %v1893_v42, %s2545_s24  ;;  %v1873_v42 = vcombine.low %v513_v35, %v513_v35  ;;  %v1888_v45 = vcombine.low %v512_v30, %v528_v40  ;;  %v838_v51 = vshll.u32 %v1887_v41, 16  ;;  %v833_v55 = vrot.slane %v831_v48, 1  ;;  %v1847_v15 = vld [vmem:[%s2869_s13 + $0x24] sm:$0x1]  ;;  %v1833_v16 = vld [vmem:[%s2869_s13 + $0x30] sm:$0xf] }
  0xd3   : > { %1279 = vmatpush1.bf16.msra.mxu0 %v2208_v33  ;;  %2027 = vmatpush1.bf16.msra.mxu1 %v2208_v33  ;;  %v836_v59 = vshrl.u32 %v1887_v41, 16  ;;  %v1896_v18 = vcombine.low %v1832_v12, %v1832_v12  ;;  %v1848_v19 = vld [vmem:[%s2869_s13 + $0x2c] sm:$0x1]  ;;  %v1897_v21 = vcombine.low %v1833_v16, %v1833_v16  ;;  %v2183_v25 = vld [vmem:[%s2879_s26 + $0x18] ss:$0 sps:$4 sm:$0xff]   ;;  %vm1087_vm2 = vcmask 64512  }
  0xd4   : > { %1926 = vmatprep.subr.msk.bf16.mxu0 %vm1269_vm0, %v1925_v36  ;;  %2025 = vmatprep.subr.msk.bf16.mxu1 %vm1269_vm0, %v1925_v36  ;;  %v845_v57 = vshll.u32 %v1888_v45, 16  ;;  %v840_v61 = vrot.slane %v838_v51, 1  ;;  %v843_v0 = vshrl.u32 %v1888_v45, 16  ;;  %v1912_v24 = vcombine.low %v1832_v12, %v1848_v19  ;;  %v2184_v28 = vld [vmem:[%s2879_s26 + $0x20] ss:$0 sps:$4 sm:$0xff]   ;;  %s3142_s15 = scalar_lea.vmem [#allocation12], %s1824_s1 }
  0xd5   : > { %950 = vrot.lane.b32.xlu0 %v2153_v44, %s2546_s11  ;;  %v1271_v44 = vsel %vm1269_vm0, %v1924_v37, 0  ;;  %v2185_v30 = vld [vmem:[%s2879_s26 + $0x28] ss:$0 sps:$4 sm:$0xff]   ;;  %v3013_v34 = vld [vmem:[%s2869_s13 + $0x30] sm:$0xf]  ;;  %vm1104_vm3 = vcmask 97280  }
  0xd6   : > { %952 = vrot.lane.b32.xlu1 %v2154_v49, %s2546_s11  ;;  %v1889_v49 = vcombine.low %v513_v35, %v529_v43  ;;  %v841_v2 = vor.u32 %v840_v61, %v836_v59  ;;  %v1021_v33 = vshll.u32 %v1912_v24, 16  ;;  %v506_v35 = vld [vmem:[%s2869_s13 + $0x34] sm:$0x1]  ;;  %v2186_v36 = vld [vmem:[%s2879_s26 + $0x30] ss:$0 sps:$4 sm:$0xff]   ;;  %v1019_v43 = vshrl.u32 %v1912_v24, 16 }
  0xd7   : > { %1281 = vmatpush1.bf16.msra.mxu0 %v1271_v44  ;;  %2028 = vmatpush1.bf16.msra.mxu1 %v1271_v44  ;;  %v3019_v40 = vld [vmem:[%s2869_s13 + $0x38] sm:$0xf]  ;;  %v507_v41 = vld [vmem:[%s2869_s13 + $0x3c] sm:$0x1]  ;;  %v1866_v45 = vcombine.low %v3013_v34, %v506_v35  ;;  %v530_v61 = vld [vmem:[%s2885_s27 + $0x34] sm:$0x1] }
  0xd8   : > { %v850_v3 = vshrl.u32 %v1889_v49, 16  ;;  %v1023_v44 = vrot.slane %v1021_v33, 1  ;;  %vm1121_vm4 = vcmask 130048   ;;  %vm1138_vm5 = vcmask 162816   ;;  %s1547_s19 = sshll.u32 %s3142_s15, 4  ;;  %p3366_p10 = scmp.ne.s32.totalorder %s3348_s17, 0  ;;  %s3154_s19 = int_to_ptr.vmem [resolvable:$true] %s1547_s19 }
  0xd9   : > { %1046 = vrot.lane.b32.xlu0 %v996_v54, %s2547_s22  ;;  %v829_v54 = vshrl.u32 %v1886_v38, 16  ;;  %vm1155_vm6 = vcmask 195584   ;;  %vm1172_vm7 = vcmask 228352   ;;  %vm1189_vm8 = vcmask 261120  }
  0xda   : > { %1048 = vrot.lane.b32.xlu1 %v1003_v58, %s2547_s22  ;;  %v2174_v58 = vld [vmem:[%s2888_s21 + $0x28] ss:$0 sps:$4 sm:$0xff]   ;;  %v1024_v51 = vor.u32 %v1023_v44, %v1019_v43  ;;  %vm1256_vm9 = vcmask 293888  }
  0xdb   : > { %v834_v63 = vor.u32 %v833_v55, %v829_v54 }
  0xdd   : > { %586 = vrot.lane.b32.xlu0 %v2155_v62, %s2541_s10  ;;  %v852_v62 = vshll.u32 %v1889_v49, 16 }
  0xde   : > { %588 = vrot.lane.b32.xlu1 %v2156_v1, %s2541_s10  ;;  %v847_v1 = vrot.slane %v845_v57, 1  ;;  %v2187_v57 = vld [vmem:[%s2879_s26 + $0x30] ss:$0 sps:$4 sm:$0xff]  }
  0xe0   : > { %v848_v5 = vor.u32 %v847_v1, %v843_v0  ;;  %v514_v1 = vld [vmem:[%s2885_s27 + $0x30] sm:$0xf] }
  0xe1   : > { %590 = vrot.lane.b32.xlu0 %v2157_v4, %s2541_s10  ;;  %v854_v4 = vrot.slane %v852_v62, 1  ;;  %v2188_v62 = vld [vmem:[%s2879_s26 + $0x38] ss:$0 sps:$4 sm:$0xff]  }
  0xe2   : > { %592 = vrot.lane.b32.xlu1 %v2158_v9, %s2541_s10  ;;  %v1831_v9 = vld [vmem:[%s2869_s13 + $0x20] sm:$0xf] }
  0xe3   : > { %v855_v7 = vor.u32 %v854_v4, %v850_v3  ;;  %v1890_v4 = vcombine.low %v514_v1, %v530_v61 }
  0xe5   : > { %698 = vrot.lane.b32.xlu0 %v658_v14, %s2543_s25  ;;  %v1895_v14 = vcombine.low %v1831_v9, %v1831_v9 }
  0xe6   : > { %700 = vrot.lane.b32.xlu1 %v665_v17, %s2543_s25  ;;  %v1910_v17 = vcombine.low %v1830_v6, %v1846_v11 }
  0xe8   : > { %v1007_v26 = vshll.u32 %v1910_v17, 16  ;;  %v1005_v31 = vshrl.u32 %v1910_v17, 16  ;;  %v1850_v17 = vld [vmem:[%s2869_s13 + $0x3c] sm:$0x1] }
  0xe9   : > { %702 = vrot.lane.b32.xlu0 %v672_v20, %s2543_s25  ;;  %v1911_v20 = vcombine.low %v1831_v9, %v1847_v15  ;;  %v1874_v9 = vcombine.low %v514_v1, %v514_v1  ;;  %v857_v15 = vshrl.u32 %v1890_v4, 16 }
  0xea   : > { %704 = vrot.lane.b32.xlu1 %v679_v23, %s2543_s25  ;;  %v1849_v23 = vld [vmem:[%s2869_s13 + $0x34] sm:$0x1] }
  0xeb   : > { %v1014_v29 = vshll.u32 %v1911_v20, 16  ;;  %v1012_v37 = vshrl.u32 %v1911_v20, 16 }
  0xed   : > { %738 = vrot.lane.b32.xlu0 %v1870_v27, %s2540_s16  ;;  %v1913_v27 = vcombine.low %v1833_v16, %v1849_v23  ;;  %v1016_v38 = vrot.slane %v1014_v29, 1  ;;  %v1851_v23 = vld [vmem:[%s2869_s13 + $0x44] sm:$0x1] }
  0xee   : > { %740 = vrot.lane.b32.xlu1 %v1871_v32, %s2540_s16  ;;  %v1009_v32 = vrot.slane %v1007_v26, 1  ;;  %v1835_v26 = vld [vmem:[%s2869_s13 + $0x40] sm:$0xf] }
  0xef   : > { %v1026_v48 = vshrl.u32 %v1913_v27, 16  ;;  %v1899_v33 = vcombine.low %v1835_v26, %v1835_v26 }
  0xf1   : > { %742 = vrot.lane.b32.xlu0 %v1872_v39, %s2540_s16  ;;  %v1028_v39 = vshll.u32 %v1913_v27, 16 }
  0xf2   : > { %744 = vrot.lane.b32.xlu1 %v1873_v42, %s2540_s16  ;;  %v1010_v42 = vor.u32 %v1009_v32, %v1005_v31 }
  0xf3   : > { %v1030_v49 = vrot.slane %v1028_v39, 1 }
  0xf5   : > { %778 = vrot.lane.b32.xlu0 %v2171_v46, %s2542_s12  ;;  %v1017_v46 = vor.u32 %v1016_v38, %v1012_v37  ;;  %v1031_v54 = vor.u32 %v1030_v49, %v1026_v48 }
  0xf6   : > { %780 = vrot.lane.b32.xlu1 %v2172_v50, %s2542_s12  ;;  %v1867_v50 = vcombine.low %v3019_v40, %v507_v41 }
  0xf8   : > { %v690_v55 = vshll.u32 %v1867_v50, 16 }
  0xf9   : > { %782 = vrot.lane.b32.xlu0 %v2173_v53, %s2542_s12  ;;  %v683_v53 = vshll.u32 %v1866_v45, 16 }
  0xfa   : > { %784 = vrot.lane.b32.xlu1 %v2174_v58, %s2542_s12  ;;  %v681_v58 = vshrl.u32 %v1866_v45, 16  ;;  %v692_v0 = vrot.slane %v690_v55, 1 }
  0xfb   : > { %v685_v59 = vrot.slane %v683_v53, 1 }
  0xfd   : > { %874 = vrot.lane.b32.xlu0 %v834_v63, %s2544_s18  ;;  %v688_v63 = vshrl.u32 %v1867_v50, 16  ;;  %v686_v3 = vor.u32 %v685_v59, %v681_v58 }
  0xfe   : > { %876 = vrot.lane.b32.xlu1 %v841_v2, %s2544_s18  ;;  %v531_v2 = vld [vmem:[%s2885_s27 + $0x3c] sm:$0x1] }
  0xff   : > { %v693_v6 = vor.u32 %v692_v0, %v688_v63 }
 0x101   : > { %878 = vrot.lane.b32.xlu0 %v848_v5, %s2544_s18  ;;  %v515_v5 = vld [vmem:[%s2885_s27 + $0x38] sm:$0xf] }
 0x102   : > { %880 = vrot.lane.b32.xlu1 %v855_v7, %s2544_s18  ;;  %v1891_v7 = vcombine.low %v515_v5, %v531_v2  ;;  %v1875_v11 = vcombine.low %v515_v5, %v515_v5 }
 0x104   : > { %v866_v12 = vshll.u32 %v1891_v7, 16  ;;  %v864_v19 = vshrl.u32 %v1891_v7, 16 }
 0x105   : > { %914 = vrot.lane.b32.xlu0 %v1894_v10, %s2545_s24  ;;  %v859_v10 = vshll.u32 %v1890_v4, 16 }
 0x106   : > { %916 = vrot.lane.b32.xlu1 %v1895_v14, %s2545_s24  ;;  %v2195_v14 = vld [vmem:[%s2888_s21 + $0x30] ss:$0 sps:$4 sm:$0xff]   ;;  %v868_v20 = vrot.slane %v866_v12, 1 }
 0x107   : > { %v861_v16 = vrot.slane %v859_v10, 1 }
 0x108   : > { %v869_v27 = vor.u32 %v868_v20, %v864_v19 }
 0x109   : > { %918 = vrot.lane.b32.xlu0 %v1896_v18, %s2545_s24  ;;  %v2196_v18 = vld [vmem:[%s2888_s21 + $0x38] ss:$0 sps:$4 sm:$0xff]   ;;  %v862_v24 = vor.u32 %v861_v16, %v857_v15 }
 0x10a   : > { %920 = vrot.lane.b32.xlu1 %v1897_v21, %s2545_s24  ;;  %v1834_v21 = vld [vmem:[%s2869_s13 + $0x38] sm:$0xf]  ;;  %s1531_s13 = sshll.u32 %s3139_s4, 4  ;;  %s3152_s13 = int_to_ptr.vmem [resolvable:$true] %s1531_s13 }
 0x10b   : > { %v1898_v29 = vcombine.low %v1834_v21, %v1834_v21 }
 0x10d   : > { %954 = vrot.lane.b32.xlu0 %v2183_v25, %s2546_s11  ;;  %v1914_v25 = vcombine.low %v1834_v21, %v1850_v17 }
 0x10e   : > { %956 = vrot.lane.b32.xlu1 %v2184_v28, %s2546_s11  ;;  %v1915_v28 = vcombine.low %v1835_v26, %v1851_v23 }
 0x10f   : > { %v1033_v37 = vshrl.u32 %v1914_v25, 16 }
 0x110   : > { %v1042_v35 = vshll.u32 %v1915_v28, 16  ;;  %v1040_v43 = vshrl.u32 %v1915_v28, 16 }
 0x111   : > { %958 = vrot.lane.b32.xlu0 %v2185_v30, %s2546_s11  ;;  %v1035_v30 = vshll.u32 %v1914_v25, 16 }
 0x112   : > { %960 = vrot.lane.b32.xlu1 %v2186_v36, %s2546_s11  ;;  %v2201_v36 = vld [vmem:[%s2879_s26 + $0x38] ss:$0 sps:$4 sm:$0xff]   ;;  %v1044_v44 = vrot.slane %v1042_v35, 1 }
 0x113   : > { %v1037_v38 = vrot.slane %v1035_v30, 1 }
 0x114   : > { %v1045_v48 = vor.u32 %v1044_v44, %v1040_v43 }
 0x115   : > { %1050 = vrot.lane.b32.xlu0 %v1010_v42, %s2547_s22  ;;  %v2202_v42 = vld [vmem:[%s2879_s26 + $0x40] ss:$0 sps:$4 sm:$0xff]   ;;  %v1038_v45 = vor.u32 %v1037_v38, %v1033_v37  ;;  %s1975_s26 = sshll.u32 %s2620_s9, 9 }
 0x116   : > { %1052 = vrot.lane.b32.xlu1 %v1017_v46, %s2547_s22  ;;  %s3159_s21 = scalar_lea.hbm %s3324_s5, %s1975_s26 }
 0x119   : > { %1054 = vrot.lane.b32.xlu0 %v1024_v51, %s2547_s22 }
 0x11a   : > { %1056 = vrot.lane.b32.xlu1 %v1031_v54, %s2547_s22 }
 0x11d   : > { %594 = vrot.lane.b32.xlu0 %v2187_v57, %s2541_s10 }
 0x11e   : > { %596 = vrot.lane.b32.xlu1 %v2188_v62, %s2541_s10 }
 0x121   : > { %706 = vrot.lane.b32.xlu0 %v686_v3, %s2543_s25 }
 0x122   : > { %708 = vrot.lane.b32.xlu1 %v693_v6, %s2543_s25  ;;  %s3166_s25 = scalar_lea.hbm %s3325_s6, %s1975_s26 }
 0x125   : > { %746 = vrot.lane.b32.xlu0 %v1874_v9, %s2540_s16 }
 0x126   : > { %748 = vrot.lane.b32.xlu1 %v1875_v11, %s2540_s16 }
 0x129   : > { %786 = vrot.lane.b32.xlu0 %v2195_v14, %s2542_s12 }
 0x12a   : > { %788 = vrot.lane.b32.xlu1 %v2196_v18, %s2542_s12 }
 0x12d   : > { %882 = vrot.lane.b32.xlu0 %v862_v24, %s2544_s18 }
 0x12e   : > { %884 = vrot.lane.b32.xlu1 %v869_v27, %s2544_s18  ;;  %s1503_s18 = scalar_lea.sflag [#allocation4], %s2865_s14 }
 0x12f   : > { %v737_v31 = vpop.permute.xlu1 %736  ;;  %v583_v32 = vpop.permute.xlu0 %582 }
 0x130   : > { %v1065_v54 = vsel %vm1062_vm1, %v2908_v8, %v583_v32 }
 0x131   : > { %922 = vrot.lane.b32.xlu0 %v1898_v29, %s2545_s24 }
 0x132   : > { %924 = vrot.lane.b32.xlu1 %v1899_v33, %s2545_s24  ;;  %s2359_s24 = scalar_lea.vmem %s3152_s13, 512 }
 0x133   : > { %v777_v39 = vpop.permute.xlu1 %776  ;;  %v585_v41 = vpop.permute.xlu0 %584  ;;  %p2360_p9 = scmp.ne.s32.totalorder %s3152_s13, %s2359_s24 }
 0x134   : > { %v1068_v55 = vsel %vm1062_vm1, %v2913_v13, %v585_v41 }
 0x135   : > { %962 = vrot.lane.b32.xlu0 %v2201_v36, %s2546_s11  ;;  %p2361_p8 = pnand %p2360_p9, %p3366_p10 }
 0x136   : > { %964 = vrot.lane.b32.xlu1 %v2202_v42, %s2546_s11  ;;  %s2549_s11 = smov [#allocation11]  }
 0x137   : > { %v735_v46 = vpop.permute.xlu0 %734  ;;  %p2362_p1 = pneg %p2361_p8 }
 0x138   : > { %v695_v49 = vpop.permute.xlu1 %694 }
 0x139   : > { %1058 = vrot.lane.b32.xlu0 %v1038_v45, %s2547_s22  ;;  %v1089_v58 = vsel %vm1087_vm2, %v1065_v54, %v695_v49 }
 0x13a   : > { %1060 = vrot.lane.b32.xlu1 %v1045_v48, %s2547_s22  ;;  %v1106_v62 = vsel %vm1104_vm3, %v1089_v58, %v735_v46  ;;  %s2363_s22 = sshll.u32 %s2549_s11, 4  ;;  %s2364_s22 = int_to_ptr.vmem [resolvable:$false] %s2363_s22 }
 0x13b   : > { %v775_v50 = vpop.permute.xlu0 %774  ;;  %s2365_s1 = scalar_lea.vmem %s2364_s22, 1024  ;;  %p2366_p6 = scmp.lt.s32.totalorder %s3152_s13, %s2364_s22 }
 0x13c   : > { %v697_v51 = vpop.permute.xlu1 %696  ;;  %v1123_v8 = vsel %vm1121_vm4, %v1106_v62, %v775_v50  ;;  %p2367_p11 = scmp.lt.s32.totalorder %s2365_s1, %s2359_s24 }
 0x13d   : > { %v1091_v59 = vsel %vm1087_vm2, %v1068_v55, %v697_v51 }
 0x13e   : > { %v1108_v63 = vsel %vm1104_vm3, %v1091_v59, %v737_v31  ;;  %p2368_p4 = por %p2367_p11, %p2366_p6 }
 0x13f   : > { %v871_v53 = vpop.permute.xlu0 %870  ;;  %v1125_v13 = vsel %vm1121_vm4, %v1108_v63, %v777_v39 }
 0x140   : > { %v873_v57 = vpop.permute.xlu1 %872  ;;  %v1140_v2 = vsel %vm1138_vm5, %v1123_v8, %v871_v53  ;;  %p2369_p13 = pnand %p2368_p4, %p2362_p1 }
 0x141   : > { %v1142_v5 = vsel %vm1138_vm5, %v1125_v13, %v873_v57 }
 0x143   : > { %v911_v61 = vpop.permute.xlu0 %910 }
 0x144   : > { %v913_v0 = vpop.permute.xlu1 %912  ;;  %v1157_v4 = vsel %vm1155_vm6, %v1140_v2, %v911_v61 }
 0x145   : > { %v1159_v9 = vsel %vm1155_vm6, %v1142_v5, %v913_v0 }
 0x147   : > { %v951_v1 = vpop.permute.xlu0 %950 }
 0x148   : > { %v953_v3 = vpop.permute.xlu1 %952  ;;  %v1174_v6 = vsel %vm1172_vm7, %v1157_v4, %v951_v1 }
 0x149   : > { %v1176_v11 = vsel %vm1172_vm7, %v1159_v9, %v953_v3 }
 0x14b   : > { %v1047_v7 = vpop.permute.xlu0 %1046 }
 0x14c   : > { %v1191_v10 = vsel %vm1189_vm8, %v1174_v6, %v1047_v7  ;;  %v1049_v12 = vpop.permute.xlu1 %1048 }
 0x14d   : > { %v1193_v14 = vsel %vm1189_vm8, %v1176_v11, %v1049_v12 }
 0x14e   : > { %v1916_v15 = vcombine.low %v1191_v10, %v1193_v14 }
 0x14f   : > { %v587_v16 = vpop.permute.xlu0 %586 }
 0x150   : > { %1927 = vmatmul.mubr.msk.bf16.vlgmr.msra.gmra.mrb[0].mxu0 %vm1256_vm9, %v1916_v15  ;;  %v589_v17 = vpop.permute.xlu1 %588  ;;  %v1071_v44 = vsel %vm1062_vm1, %v2933_v47, %v587_v16 }
 0x151   : > { %1318 = vmatprep.mubr.bf16.mxu0 %v2548_v22  ;;  %v1074_v48 = vsel %vm1062_vm1, %v2939_v52, %v589_v17 }
 0x153   : > { %v591_v18 = vpop.permute.xlu0 %590 }
 0x154   : > { %v593_v19 = vpop.permute.xlu1 %592  ;;  %v1077_v54 = vsel %vm1062_vm1, %v2945_v56, %v591_v18 }
 0x155   : > { %v1080_v61 = vsel %vm1062_vm1, %v2951_v60, %v593_v19 }
 0x157   : > { %v699_v20 = vpop.permute.xlu0 %698 }
 0x158   : > { %v701_v21 = vpop.permute.xlu1 %700  ;;  %v1093_v46 = vsel %vm1087_vm2, %v1071_v44, %v699_v20 }
 0x159   : > { %v1095_v51 = vsel %vm1087_vm2, %v1074_v48, %v701_v21 }
 0x15b   : > { %v703_v23 = vpop.permute.xlu0 %702 }
 0x15c   : > { %v705_v24 = vpop.permute.xlu1 %704  ;;  %v1097_v58 = vsel %vm1087_vm2, %v1077_v54, %v703_v23 }
 0x15d   : > { %v1099_v1 = vsel %vm1087_vm2, %v1080_v61, %v705_v24 }
 0x15f   : > { %v739_v25 = vpop.permute.xlu0 %738 }
 0x160   : > { %v741_v26 = vpop.permute.xlu1 %740  ;;  %v1110_v49 = vsel %vm1104_vm3, %v1093_v46, %v739_v25 }
 0x161   : > { %v1112_v55 = vsel %vm1104_vm3, %v1095_v51, %v741_v26 }
 0x163   : > { %v743_v27 = vpop.permute.xlu0 %742 }
 0x164   : > { %v745_v28 = vpop.permute.xlu1 %744  ;;  %v1114_v62 = vsel %vm1104_vm3, %v1097_v58, %v743_v27 }
 0x165   : > { %v1116_v3 = vsel %vm1104_vm3, %v1099_v1, %v745_v28 }
 0x167   : > { %v779_v29 = vpop.permute.xlu0 %778 }
 0x168   : > { %v781_v30 = vpop.permute.xlu1 %780  ;;  %v1127_v53 = vsel %vm1121_vm4, %v1110_v49, %v779_v29 }
 0x169   : > { %v1129_v59 = vsel %vm1121_vm4, %v1112_v55, %v781_v30 }
 0x16b   : > { %v783_v31 = vpop.permute.xlu0 %782 }
 0x16c   : > { %v785_v32 = vpop.permute.xlu1 %784  ;;  %v1131_v8 = vsel %vm1121_vm4, %v1114_v62, %v783_v31 }
 0x16d   : > { %v1133_v6 = vsel %vm1121_vm4, %v1116_v3, %v785_v32 }
 0x16f   : > { %v875_v33 = vpop.permute.xlu0 %874 }
 0x170   : > { %v877_v35 = vpop.permute.xlu1 %876  ;;  %v1144_v47 = vsel %vm1138_vm5, %v1127_v53, %v875_v33 }
 0x171   : > { %v1146_v63 = vsel %vm1138_vm5, %v1129_v59, %v877_v35 }
 0x173   : > { %v879_v36 = vpop.permute.xlu0 %878 }
 0x174   : > { %v881_v37 = vpop.permute.xlu1 %880  ;;  %v1148_v4 = vsel %vm1138_vm5, %v1131_v8, %v879_v36 }
 0x175   : > { %v1150_v10 = vsel %vm1138_vm5, %v1133_v6, %v881_v37 }
 0x177   : > { %v915_v38 = vpop.permute.xlu0 %914 }
 0x178   : > { %v917_v39 = vpop.permute.xlu1 %916  ;;  %v1161_v52 = vsel %vm1155_vm6, %v1144_v47, %v915_v38 }
 0x179   : > { %v1163_v13 = vsel %vm1155_vm6, %v1146_v63, %v917_v39 }
 0x17b   : > { %v919_v41 = vpop.permute.xlu0 %918 }
 0x17c   : > { %v921_v42 = vpop.permute.xlu1 %920  ;;  %v1165_v7 = vsel %vm1155_vm6, %v1148_v4, %v919_v41 }
 0x17d   : > { %v1167_v15 = vsel %vm1155_vm6, %v1150_v10, %v921_v42 }
 0x17f   : > { %v955_v43 = vpop.permute.xlu0 %954 }
 0x180   : > { %v957_v45 = vpop.permute.xlu1 %956  ;;  %v1178_v56 = vsel %vm1172_vm7, %v1161_v52, %v955_v43 }
 0x181   : > { %v1180_v60 = vsel %vm1172_vm7, %v1163_v13, %v957_v45 }
 0x183   : > { %v959_v50 = vpop.permute.xlu0 %958 }
 0x184   : > { %v961_v57 = vpop.permute.xlu1 %960  ;;  %v1182_v11 = vsel %vm1172_vm7, %v1165_v7, %v959_v50 }
 0x185   : > { %v1184_v17 = vsel %vm1172_vm7, %v1167_v15, %v961_v57 }
 0x187   : > { %v1051_v0 = vpop.permute.xlu0 %1050 }
 0x188   : > { %v1195_v2 = vsel %vm1189_vm8, %v1178_v56, %v1051_v0  ;;  %v1053_v5 = vpop.permute.xlu1 %1052 }
 0x189   : > { %v1197_v9 = vsel %vm1189_vm8, %v1180_v60, %v1053_v5 }
 0x18a   : > { %v1917_v12 = vcombine.low %v1195_v2, %v1197_v9 }
 0x18b   : > { %v1055_v14 = vpop.permute.xlu0 %1054 }
 0x18c   : > { %v1199_v16 = vsel %vm1189_vm8, %v1182_v11, %v1055_v14  ;;  %1928 = vmatmul.mubr.msk.bf16.gmra.mrb[4].mxu0 %vm1256_vm9, %v1917_v12  ;;  %v1057_v18 = vpop.permute.xlu1 %1056 }
 0x18d   : > { %v1201_v19 = vsel %vm1189_vm8, %v1184_v17, %v1057_v18 }
 0x18e   : > { %v1918_v20 = vcombine.low %v1199_v16, %v1201_v19 }
 0x18f   : > { %v595_v21 = vpop.permute.xlu0 %594 }
 0x190   : > { %1929 = vmatmul.mubr.msk.bf16.vlgmr.msra.gmra.mrb[0].mxu1 %vm1256_vm9, %v1918_v20  ;;  %v597_v23 = vpop.permute.xlu1 %596  ;;  %v1083_v33 = vsel %vm1062_vm1, %v3013_v34, %v595_v21 }
 0x191   : > { %1338 = vmatprep.mubr.bf16.mxu1 %v2548_v22  ;;  %v1086_v37 = vsel %vm1062_vm1, %v3019_v40, %v597_v23 }
 0x193   : > { %v707_v24 = vpop.permute.xlu0 %706 }
 0x194   : > { %v709_v25 = vpop.permute.xlu1 %708  ;;  %v1101_v36 = vsel %vm1087_vm2, %v1083_v33, %v707_v24 }
 0x195   : > { %v1103_v39 = vsel %vm1087_vm2, %v1086_v37, %v709_v25 }
 0x197   : > { %v747_v26 = vpop.permute.xlu0 %746 }
 0x198   : > { %v749_v27 = vpop.permute.xlu1 %748  ;;  %v1118_v22 = vsel %vm1104_vm3, %v1101_v36, %v747_v26 }
 0x199   : > { %v1120_v42 = vsel %vm1104_vm3, %v1103_v39, %v749_v27 }
 0x19b   : > { %v787_v28 = vpop.permute.xlu0 %786 }
 0x19c   : > { %v789_v29 = vpop.permute.xlu1 %788  ;;  %v1135_v41 = vsel %vm1121_vm4, %v1118_v22, %v787_v28 }
 0x19d   : > { %v1137_v34 = vsel %vm1121_vm4, %v1120_v42, %v789_v29 }
 0x19f   : > { %v883_v30 = vpop.permute.xlu0 %882 }
 0x1a0   : > { %v885_v31 = vpop.permute.xlu1 %884  ;;  %v1152_v43 = vsel %vm1138_vm5, %v1135_v41, %v883_v30 }
 0x1a1   : > { %v1154_v46 = vsel %vm1138_vm5, %v1137_v34, %v885_v31 }
 0x1a3   : > { %v923_v32 = vpop.permute.xlu0 %922 }
 0x1a4   : > { %v925_v35 = vpop.permute.xlu1 %924  ;;  %v1169_v45 = vsel %vm1155_vm6, %v1152_v43, %v923_v32 }
 0x1a5   : > { %v1171_v49 = vsel %vm1155_vm6, %v1154_v46, %v925_v35 }
 0x1a7   : > { %v963_v38 = vpop.permute.xlu0 %962 }
 0x1a8   : > { %v965_v44 = vpop.permute.xlu1 %964  ;;  %v1186_v40 = vsel %vm1172_vm7, %v1169_v45, %v963_v38 }
 0x1a9   : > { %v1188_v51 = vsel %vm1172_vm7, %v1171_v49, %v965_v44 }
 0x1ab   : > { %v1059_v48 = vpop.permute.xlu0 %1058 }
 0x1ac   : > { %v1203_v50 = vsel %vm1189_vm8, %v1186_v40, %v1059_v48  ;;  %v1061_v53 = vpop.permute.xlu1 %1060 }
 0x1ad   : > { %v1205_v54 = vsel %vm1189_vm8, %v1188_v51, %v1061_v53 }
 0x1ae   : > { %v1919_v55 = vcombine.low %v1203_v50, %v1205_v54 }
 0x1b0   : > { %1930 = vmatmul.mubr.msk.bf16.gmra.mrb[4].mxu1 %vm1256_vm9, %v1919_v55 }
 0x223   : > { %v1310_v47 = vpop.f32.mrb[0].mxu0 }
 0x224   : > { %v1312_v57 = vpop.f32.mrb[1].mxu0  ;;  %v1402_v59 = vmul.f32 %v1310_v47, %v1310_v47 }
 0x225   : > { %v1314_v58 = vpop.f32.mrb[2].mxu0  ;;  %v1479_v56 = vmul.f32 %v1312_v57, %v1312_v57 }
 0x226   : > { %v1980_v52 = vpack.c.bf16 %v1314_v58, %v1310_v47  ;;  %v1389_v61 = vadd.f32 %v1314_v58, %v1310_v47  ;;  %v1403_v62 = vmul.f32 %v1314_v58, %v1314_v58  ;;  %v1316_v63 = vpop.f32.mrb[3].mxu0 }
 0x227   : > { %v2000_v0 = vpack.c.bf16 %v1316_v63, %v1312_v57  ;;  %v1466_v1 = vadd.f32 %v1316_v63, %v1312_v57  ;;  %v1480_v8 = vmul.f32 %v1316_v63, %v1316_v63 }
 0x228   : > { %1981 = vst [vmem:[%s3139_s4] sm:$0xff] %v1980_v52   ;;  %v1410_v13 = vadd.f32 %v1403_v62, %v1402_v59 }
 0x229   : > { %2001 = vst [vmem:[%s3142_s15] sm:$0xff] %v2000_v0   ;;  %v1487_v2 = vadd.f32 %v1480_v8, %v1479_v56 }
 0x25f   : > { %v1320_v3 = vpop.f32.mrb[4].mxu0 }
 0x260   : > { %v1390_v4 = vadd.f32 %v1389_v61, %v1320_v3  ;;  %v1404_v60 = vmul.f32 %v1320_v3, %v1320_v3  ;;  %v1322_v5 = vpop.f32.mrb[5].mxu0 }
 0x261   : > { %v1467_v6 = vadd.f32 %v1466_v1, %v1322_v5  ;;  %v1481_v7 = vmul.f32 %v1322_v5, %v1322_v5  ;;  %v1324_v9 = vpop.f32.mrb[6].mxu0 }
 0x262   : > { %v1411_v10 = vadd.f32 %v1410_v13, %v1404_v60  ;;  %v1985_v11 = vpack.c.bf16 %v1324_v9, %v1320_v3  ;;  %v1391_v12 = vadd.f32 %v1390_v4, %v1324_v9  ;;  %v1405_v14 = vmul.f32 %v1324_v9, %v1324_v9  ;;  %v1326_v15 = vpop.f32.mrb[7].mxu0 }
 0x263   : > { %v1488_v16 = vadd.f32 %v1487_v2, %v1481_v7  ;;  %v2005_v17 = vpack.c.bf16 %v1326_v15, %v1322_v5  ;;  %v1468_v18 = vadd.f32 %v1467_v6, %v1326_v15  ;;  %v1482_v19 = vmul.f32 %v1326_v15, %v1326_v15  ;;  %v1330_v20 = vpop.f32.mrb[0].mxu1 }
 0x264   : > { %2017 = vst [vmem:[%s3139_s4 + $0x8] sm:$0xff] %v1985_v11   ;;  %v1412_v21 = vadd.f32 %v1411_v10, %v1405_v14  ;;  %v1392_v23 = vadd.f32 %v1391_v12, %v1330_v20  ;;  %v1406_v24 = vmul.f32 %v1330_v20, %v1330_v20  ;;  %v1332_v25 = vpop.f32.mrb[1].mxu1 }
 0x265   : > { %2020 = vst [vmem:[%s3142_s15 + $0x8] sm:$0xff] %v2005_v17   ;;  %v1489_v26 = vadd.f32 %v1488_v16, %v1482_v19  ;;  %v1469_v27 = vadd.f32 %v1468_v18, %v1332_v25  ;;  %v1483_v28 = vmul.f32 %v1332_v25, %v1332_v25  ;;  %v1334_v29 = vpop.f32.mrb[2].mxu1 }
 0x266   : > { %v1413_v30 = vadd.f32 %v1412_v21, %v1406_v24  ;;  %v1990_v31 = vpack.c.bf16 %v1334_v29, %v1330_v20  ;;  %v1393_v32 = vadd.f32 %v1392_v23, %v1334_v29  ;;  %v1407_v33 = vmul.f32 %v1334_v29, %v1334_v29  ;;  %v1336_v35 = vpop.f32.mrb[3].mxu1 }
 0x267   : > { %v1490_v36 = vadd.f32 %v1489_v26, %v1483_v28  ;;  %v2010_v37 = vpack.c.bf16 %v1336_v35, %v1332_v25  ;;  %v1470_v22 = vadd.f32 %v1469_v27, %v1336_v35  ;;  %v1484_v38 = vmul.f32 %v1336_v35, %v1336_v35 }
 0x268   : > { %2018 = vst [vmem:[%s3139_s4 + $0x10] sm:$0xff] %v1990_v31   ;;  %v1414_v39 = vadd.f32 %v1413_v30, %v1407_v33 }
 0x269   : > { %2021 = vst [vmem:[%s3142_s15 + $0x10] sm:$0xff] %v2010_v37   ;;  %v1491_v41 = vadd.f32 %v1490_v36, %v1484_v38 }
 0x283   : > { %v1340_v42 = vpop.f32.mrb[4].mxu1 }
 0x284   : > { %v1394_v43 = vadd.f32 %v1393_v32, %v1340_v42  ;;  %v1408_v44 = vmul.f32 %v1340_v42, %v1340_v42  ;;  %v1342_v34 = vpop.f32.mrb[5].mxu1 }
 0x285   : > { %v1471_v45 = vadd.f32 %v1470_v22, %v1342_v34  ;;  %v1485_v46 = vmul.f32 %v1342_v34, %v1342_v34  ;;  %v1344_v40 = vpop.f32.mrb[6].mxu1 }
 0x286   : > { %v1415_v48 = vadd.f32 %v1414_v39, %v1408_v44  ;;  %v1995_v49 = vpack.c.bf16 %v1344_v40, %v1340_v42  ;;  %v1395_v50 = vadd.f32 %v1394_v43, %v1344_v40  ;;  %v1409_v51 = vmul.f32 %v1344_v40, %v1344_v40  ;;  %v1346_v53 = vpop.f32.mrb[7].mxu1 }
 0x287   : > { %v1492_v54 = vadd.f32 %v1491_v41, %v1485_v46  ;;  %v2015_v55 = vpack.c.bf16 %v1346_v53, %v1342_v34  ;;  %v3161_v47 = vadd.f32 %v1471_v45, %v1346_v53  ;;  %v1486_v57 = vmul.f32 %v1346_v53, %v1346_v53 }
 0x288   : > { %2019 = vst [vmem:[%s3139_s4 + $0x18] sm:$0xff] %v1995_v49   ;;  %v1396_v58 = vrot.slane %v1395_v50, 4  ;;  %v3169_v59 = vadd.f32 %v1415_v48, %v1409_v51 }
 0x289   : > { %2022 = vst [vmem:[%s3142_s15 + $0x18] sm:$0xff] %v2015_v55   ;;  %v1473_v52 = vrot.slane %v3161_v47, 4  ;;  %v3173_v61 = vadd.f32 %v1492_v54, %v1486_v57 }
 0x28a   : > { %2372 = shalt.err (!%p2369_p13)
}
 0x28b   : > { %s2373_s4 = scalar_lea.hbm %s3159_s21, 512  ;;  %s2377_s27 = scalar_lea.hbm %s3324_s5, 1024 }
 0x28c   : > { %p2374_p3 = scmp.ne.s32.totalorder %s3159_s21, %s2373_s4  ;;  %p2378_p0 = scmp.lt.u32.totalorder %s3159_s21, %s3324_s5 }
 0x28d   : > { %p2379_p5 = scmp.lt.u32.totalorder %s2377_s27, %s2373_s4  ;;  %p2381_p9 = scmp.lt.u32.totalorder %s2373_s4, %s3159_s21 }
 0x28e   : > { %p2375_p2 = pnand %p2374_p3, %p3366_p10 }
 0x28f   : > { %p2380_p7 = por %p2379_p5, %p2378_p0 }
 0x290   : > { %p2376_p12 = pneg %p2375_p2 }
 0x291   : > { %p2382_p8 = por %p2381_p9, %p2380_p7 }
 0x293   : > { %p2383_p1 = pnand %p2382_p8, %p2376_p12 }
 0x295   : > { %2386 = shalt.err (!%p2383_p1)
}
 0x296   : > { %s2550_s12 = smov 64   ;;  %v1397_v62 = vadd.f32 %v1396_v58, %v1395_v50  ;;  %v1417_v63 = vrot.slane %v3169_v59, 4  ;;  %s1508_s24 = scalar_lea.sflag [#allocation13], %s2876_s23 }
 0x297   : > { %2050 = dma.vmem_to_hbm [thread:$0]  (%p3366_p10), %s3152_s13, 512, %s3159_s21, %s1503_s18, %s2550_s12, %s2550_s12, %s2541_s10  }
 0x298   : > { %s2387_s11 = scalar_lea.vmem %s3154_s19, 512  ;;  %s2551_s22 = smov [#allocation12]  }
 0x299   : > { %p2388_p6 = scmp.ne.s32.totalorder %s3154_s19, %s2387_s11  ;;  %s2391_s1 = sshll.u32 %s2551_s22, 4  ;;  %s2392_s1 = int_to_ptr.vmem [resolvable:$false] %s2391_s1 }
 0x29a   : > { %s2393_s4 = scalar_lea.vmem %s2392_s1, 1024  ;;  %p2394_p13 = scmp.lt.s32.totalorder %s3154_s19, %s2392_s1 }
 0x29b   : > { %p2389_p11 = pnand %p2388_p6, %p3366_p10  ;;  %p2395_p3 = scmp.lt.s32.totalorder %s2393_s4, %s2387_s11 }
 0x29d   : > { %p2390_p4 = pneg %p2389_p11  ;;  %p2396_p2 = por %p2395_p3, %p2394_p13 }
 0x29f   : > { %p2397_p12 = pnand %p2396_p2, %p2390_p4 }
 0x2a1   : > { %2400 = shalt.err (!%p2397_p12)
}
 0x2a2   : > { %s2401_s13 = scalar_lea.hbm %s3166_s25, 512  ;;  %s2405_s15 = scalar_lea.hbm %s3325_s6, 1024 }
 0x2a3   : > { %p2402_p0 = scmp.ne.s32.totalorder %s3166_s25, %s2401_s13  ;;  %p2406_p9 = scmp.lt.u32.totalorder %s3166_s25, %s3325_s6 }
 0x2a4   : > { %p2407_p8 = scmp.lt.u32.totalorder %s2405_s15, %s2401_s13  ;;  %p2409_p6 = scmp.lt.u32.totalorder %s2401_s13, %s3166_s25 }
 0x2a5   : > { %p2403_p5 = pnand %p2402_p0, %p3366_p10 }
 0x2a6   : > { %p2408_p1 = por %p2407_p8, %p2406_p9 }
 0x2a7   : > { %p2404_p7 = pneg %p2403_p5 }
 0x2a8   : > { %p2410_p11 = por %p2409_p6, %p2408_p1 }
 0x2aa   : > { %p2411_p4 = pnand %p2410_p11, %p2404_p7 }
 0x2ac   : > { %2414 = shalt.err (!%p2411_p4)
}
 0x2ad   : > { %2051 = dma.vmem_to_hbm [thread:$0]  (%p3366_p10), %s3154_s19, 512, %s3166_s25, %s1508_s24, %s2550_s12, %s2550_s12, %s2541_s10   ;;  %v1474_v56 = vadd.f32 %v1473_v52, %v3161_v47  ;;  %v1494_v0 = vrot.slane %v3173_v61, 4  ;;  %v1398_v1 = vrot.slane %v1397_v62, 2  ;;  %v1418_v8 = vadd.f32 %v1417_v63, %v3169_v59 }
 0x2ae   : > { %s1826_s20 = sshll.u32 %s2865_s14, 1  ;;  %s1955_s10 = sshll.u32 %s2620_s9, 5  ;;  %vm1423_vm10 = vcmask 1040384  }
 0x2af   : > { %v1475_v13 = vrot.slane %v1474_v56, 2  ;;  %v1495_v2 = vadd.f32 %v1494_v0, %v3173_v61  ;;  %v1399_v3 = vadd.f32 %v1398_v1, %v1397_v62  ;;  %v1419_v4 = vrot.slane %v1418_v8, 2  ;;  %s475_s19 = scalar_lea.vmem [#allocation14], %s1826_s20  ;;  %s3236_s16 = scalar_lea.vmem [#allocation15], %s1826_s20 }
 0x2b0   : > { %s1563_s25 = sshll.u32 %s475_s19, 4  ;;  %s1576_s12 = sshll.u32 %s3236_s16, 4  ;;  %s3244_s25 = int_to_ptr.vmem [resolvable:$true] %s1563_s25  ;;  %s3251_s12 = int_to_ptr.vmem [resolvable:$true] %s1576_s12 }
 0x2b1   : > { %v1476_v60 = vadd.f32 %v1475_v13, %v1474_v56  ;;  %v1496_v5 = vrot.slane %v1495_v2, 2  ;;  %v1400_v6 = vrot.slane %v1399_v3, 1  ;;  %v1420_v7 = vadd.f32 %v1419_v4, %v1418_v8  ;;  %s3242_s1 = scalar_lea.hbm %s3326_s7, %s1955_s10  ;;  %s3249_s13 = scalar_lea.hbm %s3327_s8, %s1955_s10 }
 0x2b2   : > { %s2415_s21 = scalar_lea.vmem %s3244_s25, 32  ;;  %s2552_s18 = smov [#allocation14]  }
 0x2b3   : > { %v1477_v9 = vrot.slane %v1476_v60, 1  ;;  %v1497_v10 = vadd.f32 %v1496_v5, %v1495_v2  ;;  %v1421_v11 = vrot.slane %v1420_v7, 1  ;;  %v1401_v14 = vadd.f32 %v1400_v6, %v1399_v3  ;;  %p2416_p13 = scmp.ne.s32.totalorder %s3244_s25, %s2415_s21  ;;  %s2419_s15 = sshll.u32 %s2552_s18, 4  ;;  %s2420_s15 = int_to_ptr.vmem [resolvable:$false] %s2419_s15 }
 0x2b4   : > { %s2421_s26 = scalar_lea.vmem %s2420_s15, 64  ;;  %p2422_p12 = scmp.lt.s32.totalorder %s3244_s25, %s2420_s15 }
 0x2b5   : > { %v1498_v12 = vrot.slane %v1497_v10, 1  ;;  %v1422_v15 = vadd.f32 %v1421_v11, %v1420_v7  ;;  %v1478_v16 = vadd.f32 %v1477_v9, %v1476_v60  ;;  %p2417_p3 = pnand %p2416_p13, %p3366_p10  ;;  %p2423_p0 = scmp.lt.s32.totalorder %s2421_s26, %s2415_s21 }
 0x2b7   : > { %v1499_v17 = vadd.f32 %v1498_v12, %v1497_v10  ;;  %v1424_v18 = vsel %vm1423_vm10, %v1401_v14, %v1422_v15  ;;  %p2418_p2 = pneg %p2417_p3  ;;  %p2424_p5 = por %p2423_p0, %p2422_p12 }
 0x2b8   : > { %1425 = vst [vmem:[%s475_s19] sm:$0x3] %v1424_v18 }
 0x2b9   : > { %v1500_v19 = vsel %vm1423_vm10, %v1478_v16, %v1499_v17  ;;  %p2425_p7 = pnand %p2424_p5, %p2418_p2 }
 0x2bb   : > { %2428 = shalt.err (!%p2425_p7)
}
 0x2bc   : > { %s2429_s27 = scalar_lea.hbm %s3242_s1, 32  ;;  %s2433_s19 = scalar_lea.hbm %s3326_s7, 64 }
 0x2bd   : > { %p2430_p9 = scmp.ne.s32.totalorder %s3242_s1, %s2429_s27  ;;  %p2434_p6 = scmp.lt.u32.totalorder %s3242_s1, %s3326_s7 }
 0x2be   : > { %p2435_p11 = scmp.lt.u32.totalorder %s2433_s19, %s2429_s27  ;;  %p2437_p13 = scmp.lt.u32.totalorder %s2429_s27, %s3242_s1 }
 0x2bf   : > { %p2431_p8 = pnand %p2430_p9, %p3366_p10 }
 0x2c0   : > { %p2436_p4 = por %p2435_p11, %p2434_p6 }
 0x2c1   : > { %p2432_p1 = pneg %p2431_p8 }
 0x2c2   : > { %p2438_p3 = por %p2437_p13, %p2436_p4 }
 0x2c4   : > { %p2439_p2 = pnand %p2438_p3, %p2432_p1 }
 0x2c6   : > { %2442 = shalt.err (!%p2439_p2)
}
 0x2c7   : > { %2052 = dma.vmem_to_hbm [thread:$0]  (%p3366_p10), %s3244_s25, 32, %s3242_s1, %s1508_s24   ;;  %1501 = vst [vmem:[%s3236_s16] sm:$0x3] %v1500_v19 }
 0x2c8   : > { %s1518_s9 = scalar_lea.sflag [#allocation16], %s2865_s14  ;;  %s2443_s4 = scalar_lea.vmem %s3251_s12, 32 }
 0x2c9   : > { %p2444_p12 = scmp.ne.s32.totalorder %s3251_s12, %s2443_s4  ;;  %s2553_s21 = smov [#allocation15]  }
 0x2ca   : > { %s2447_s18 = sshll.u32 %s2553_s21, 4  ;;  %s2448_s18 = int_to_ptr.vmem [resolvable:$false] %s2447_s18 }
 0x2cb   : > { %p2445_p0 = pnand %p2444_p12, %p3366_p10  ;;  %s2449_s23 = scalar_lea.vmem %s2448_s18, 64 }
 0x2cc   : > { %p2450_p7 = scmp.lt.s32.totalorder %s3251_s12, %s2448_s18  ;;  %p2451_p9 = scmp.lt.s32.totalorder %s2449_s23, %s2443_s4 }
 0x2cd   : > { %p2446_p5 = pneg %p2445_p0 }
 0x2ce   : > { %p2452_p8 = por %p2451_p9, %p2450_p7 }
 0x2d0   : > { %p2453_p1 = pnand %p2452_p8, %p2446_p5 }
 0x2d2   : > { %2456 = shalt.err (!%p2453_p1)
}
 0x2d3   : > { %s2457_s14 = scalar_lea.hbm %s3249_s13, 32  ;;  %s2461_s16 = scalar_lea.hbm %s3327_s8, 64 }
 0x2d4   : > { %p2458_p6 = scmp.ne.s32.totalorder %s3249_s13, %s2457_s14  ;;  %p2462_p13 = scmp.lt.u32.totalorder %s3249_s13, %s3327_s8 }
 0x2d5   : > { %p2463_p3 = scmp.lt.u32.totalorder %s2461_s16, %s2457_s14  ;;  %p2465_p12 = scmp.lt.u32.totalorder %s2457_s14, %s3249_s13 }
 0x2d6   : > { %p2459_p11 = pnand %p2458_p6, %p3366_p10 }
 0x2d7   : > { %p2464_p2 = por %p2463_p3, %p2462_p13 }
 0x2d8   : > { %p2460_p4 = pneg %p2459_p11 }
 0x2d9   : > { %p2466_p0 = por %p2465_p12, %p2464_p2 }
 0x2db   : > { %p2467_p5 = pnand %p2466_p0, %p2460_p4 }
 0x2dd   : > { %2470 = shalt.err (!%p2467_p5)
}
 0x2de   : > { %2053 = dma.vmem_to_hbm [thread:$0]  (%p3366_p10), %s3251_s12, 32, %s3249_s13, %s1518_s9  }
 0x2df PF: > { %s3367_s26 = sld [smem:[#allocation24_spill]]  ;;  %s3368_s27 = sld [smem:[#allocation27_spill]] }
 0x2e0   : > { %p3370_p9 = scmp.ge.s32.totalorder %s2529_s30, 2 }
 0x2e5   : > { %s1588_s20 = sand.u32 1, %s3367_s26   ;;  %p3369_p7 = scmp.ne.s32.totalorder %s3368_s27, 0 }
 0x2e6   : > { %s1589_s10 = scalar_lea.sflag [#allocation4], %s1588_s20 }
 0x2e7   : > { %p2076_p8 = pnand %p3370_p9, %p3369_p7 }
 0x2e9   : > { %2504 = dma.done.wait (!%p2076_p8), %s1589_s10, 512  }
 0x2ea   : > { %2506 = vsyncadd (!%p2076_p8), %s1589_s10, 4294966784  ;;  %s3371_s19 = sadd.s32 4294967294, %s2529_s30  }
 0x2eb   : > { %s1597_s11 = sand.u32 1, %s3371_s19  }
 0x2ec   : > { %s1598_s22 = scalar_lea.sflag [#allocation13], %s1597_s11 }
 0x2ed   : > { %2508 = dma.done.wait (!%p2076_p8), %s1598_s22, 544  }
 0x2ee   : > { %2510 = vsyncadd (!%p2076_p8), %s1598_s22, 4294966752  ;;  %s1616_s17 = scalar_lea.sflag [#allocation16], %s1588_s20 }
 0x2ef   : > { %2512 = dma.done.wait (!%p2076_p8), %s1616_s17, 32  }
 0x2f0   : > { %2514 = vsyncadd (!%p2076_p8), %s1616_s17, 4294967264  ;;  %s3372_s30 = sld [smem:[#allocation25_spill]]  ;;  %s3373_s12 = sld [smem:[#allocation26_spill]] }
 0x2f1   : > { %s3374_s27 = smov %s2521_s28  ;;  %s3375_s28 = smov %s2525_s29 }
 0x2f6   : > { %p34_p10 = scmp.ge.s32.totalorder %s3372_s30, 4   ;;  %s3376_s29 = smov %s3373_s12 }
 0x2f8   :  { %36 = sbr.rel (!%p34_p10) target bundleno = 16 (0x10), region = 177 }
 0x2ff   :  { %1621 = vsyncpa [#allocation3], 1 }
 0x300   :  { %1623 = vsyncpa [#allocation3 + $0x1], 1 }
 0x301   :  { %1624 = vsyncpa [#allocation6], 1 }
 0x302   :  { %1626 = vsyncpa [#allocation6 + $0x1], 1 }
 0x303   :  { %1627 = vsyncpa [#allocation9], 1 }
 0x304   :  { %1629 = vsyncpa [#allocation9 + $0x1], 1 }
 0x305   :  { %1630 = vsyncpa [#allocation4], 1 }
 0x306   :  { %1632 = vsyncpa [#allocation4 + $0x1], 1 }
 0x307   :  { %1633 = vsyncpa [#allocation13], 1 }
 0x308   :  { %1635 = vsyncpa [#allocation13 + $0x1], 1 }
 0x309   :  { %1636 = vsyncpa [#allocation16], 1 }
 0x30a   :  { %1638 = vsyncpa [#allocation16 + $0x1], 1 }

</bundles_post_ra>
